<compile_context>
chip_gen: v7x
topology: tpu7x:2x2x1
jax: 0.10.0
libtpu: 0.0.40
codegen_flags: <defaults>
</compile_context>

<pallas_src>
import functools

import jax
import jax.numpy as jnp
import numpy as np
from jax.experimental import pallas as pl
from jax.experimental.pallas import tpu as pltpu


def encoder_kernel(x_ref, wih0_ref, wih_rest_ref, whh_ref, b_ref,
                   hidden_ref, cell_ref):
    """Fused multi-layer LSTM encoder (batch = 1).

    x_ref:        (seq_len, n_features)        VMEM
    wih0_ref:     (n_features, 4*H)            VMEM  (layer-0 W_ih, transposed)
    wih_rest_ref: (max(L-1,1), H, 4*H)         VMEM  (layers 1.. W_ih, transposed)
    whh_ref:      (L, H, 4*H)                  VMEM  (W_hh transposed)
    b_ref:        (L, 1, 4*H)                  VMEM  (b_ih + b_hh)
    hidden_ref:   (L, 1, H)                    output: final hidden per layer
    cell_ref:     (L, 1, H)                    output: final cell per layer
    """
    num_layers = whh_ref.shape[0]
    H = hidden_ref.shape[2]
    seq_len = x_ref.shape[0]

    # Inter-layer activations carried as a value (no HBM / VMEM round-trip).
    x_in = x_ref[...]                                    # (seq_len, in_dim)

    for layer in range(num_layers):                      # static layer loop
        # Hoisted (once-per-layer) weight / bias loads.
        if layer == 0:
            wih = wih0_ref[...]                          # (n_features, 4H)
        else:
            wih = wih_rest_ref[layer - 1]                # (H, 4H)
        whh = whh_ref[layer]                             # (H, 4H)
        b = b_ref[layer]                                 # (1, 4H)

        # Input projection for all timesteps at once on the MXU.
        gx = jnp.dot(x_in, wih, preferred_element_type=jnp.float32) + b

        # Zero initial states (matches torch.zeros h_1 / c_1), kept in vregs.
        h = jnp.zeros((1, H), jnp.float32)
        c = jnp.zeros((1, H), jnp.float32)

        outs = []
        last_layer = layer == num_layers - 1
        for t in range(seq_len):                         # fully unrolled
            g = gx[t:t + 1, :] + jnp.dot(h, whh,
                                         preferred_element_type=jnp.float32)
            # PyTorch LSTM gate order: input, forget, cell(g), output.
            i_g = jax.nn.sigmoid(g[:, 0 * H:1 * H])
            f_g = jax.nn.sigmoid(g[:, 1 * H:2 * H])
            g_g = jnp.tanh(g[:, 2 * H:3 * H])
            o_g = jax.nn.sigmoid(g[:, 3 * H:4 * H])
            c = f_g * c + i_g * g_g
            h = o_g * jnp.tanh(c)
            if not last_layer:
                outs.append(h)                           # next layer's input

        hidden_ref[layer] = h                            # single store / layer
        cell_ref[layer] = c
        if not last_layer:
            x_in = jnp.concatenate(outs, axis=0)         # (seq_len, H), value


def encoder_forward_pallas(x_seq, wih0_t, wih_rest, whh, bias, num_layers, hidden):
    vmem = pl.BlockSpec(memory_space=pltpu.MemorySpace.VMEM)
    out_shape = (
        jax.ShapeDtypeStruct((num_layers, 1, hidden), jnp.float32),  # hidden
        jax.ShapeDtypeStruct((num_layers, 1, hidden), jnp.float32),  # cell
    )
    return pl.pallas_call(
        encoder_kernel,
        out_shape=out_shape,
        in_specs=[vmem, vmem, vmem, vmem, vmem],
        out_specs=(vmem, vmem),
        compiler_params=pltpu.CompilerParams(
            vmem_limit_bytes=32 * 1024 * 1024),
    )(x_seq, wih0_t, wih_rest, whh, bias)


class EncoderPallas:
    """JAX/Pallas equivalent of the PyTorch Encoder (forward only, eval mode)."""

    def __init__(self, seq_len, n_features, embedding_dim, num_layers,
                 dropout=0.0, bidirectional=False, key=None):
        assert not bidirectional, "bidirectional=False is the module default"
        self.seq_len = seq_len
        self.n_features = n_features
        self.hidden_size = embedding_dim
        self.num_layers = num_layers
        self.dropout = dropout  # identity at inference

        if key is None:
            key = jax.random.PRNGKey(0)
        H = embedding_dim
        bound = 1.0 / np.sqrt(H)

        # Raw PyTorch-layout params (kept for the pure-JAX reference check).
        self.params = []
        for layer in range(num_layers):
            in_dim = n_features if layer == 0 else H
            key, k1, k2, k3, k4 = jax.random.split(key, 5)
            # PyTorch shapes: W_ih (4H, in_dim), W_hh (4H, H), b_ih/b_hh (4H,)
            w_ih = jax.random.uniform(k1, (4 * H, in_dim), jnp.float32, -bound, bound)
            w_hh = jax.random.uniform(k2, (4 * H, H), jnp.float32, -bound, bound)
            b_ih = jax.random.uniform(k3, (4 * H,), jnp.float32, -bound, bound)
            b_hh = jax.random.uniform(k4, (4 * H,), jnp.float32, -bound, bound)
            self.params.append((w_ih, w_hh, b_ih, b_hh))

        # Kernel-layout params: transposed / combined ONCE at init time.
        self.wih0_t = jnp.transpose(self.params[0][0])            # (n_features, 4H)
        if num_layers > 1:
            self.wih_rest = jnp.stack(
                [jnp.transpose(p[0]) for p in self.params[1:]])   # (L-1, H, 4H)
        else:
            self.wih_rest = jnp.zeros((1, H, 4 * H), jnp.float32)  # unused dummy
        self.whh = jnp.stack(
            [jnp.transpose(p[1]) for p in self.params])           # (L, H, 4H)
        self.bias = jnp.stack(
            [(p[2] + p[3]).reshape(1, -1) for p in self.params])  # (L, 1, 4H)

    @functools.partial(jax.jit, static_argnums=0)
    def forward(self, x):
        # x -> (1, seq_len, n_features); drop the batch=1 axis for the kernel.
        x_seq = x.reshape((self.seq_len, self.n_features)).astype(jnp.float32)
        hidden, cell = encoder_forward_pallas(
            x_seq, self.wih0_t, self.wih_rest, self.whh, self.bias,
            self.num_layers, self.hidden_size)
        return hidden, cell                      # (num_layers, 1, H) each


def lstm_reference(x, params, seq_len, n_features, H):
    """Pure-JAX reference of the same forward pass, for a sanity check."""
    x_seq = x.reshape((seq_len, n_features)).astype(jnp.float32)
    hs, cs = [], []
    for (w_ih, w_hh, b_ih, b_hh) in params:
        h = jnp.zeros((1, H), jnp.float32)
        c = jnp.zeros((1, H), jnp.float32)
        outs = []
        for t in range(seq_len):
            g = x_seq[t:t + 1] @ w_ih.T + h @ w_hh.T + b_ih + b_hh
            i_g = jax.nn.sigmoid(g[:, 0 * H:1 * H])
            f_g = jax.nn.sigmoid(g[:, 1 * H:2 * H])
            g_g = jnp.tanh(g[:, 2 * H:3 * H])
            o_g = jax.nn.sigmoid(g[:, 3 * H:4 * H])
            c = f_g * c + i_g * g_g
            h = o_g * jnp.tanh(c)
            outs.append(h)
        hs.append(h)
        cs.append(c)
        x_seq = jnp.concatenate(outs, axis=0)
    return jnp.stack(hs, axis=0), jnp.stack(cs, axis=0)


if __name__ == "__main__":
    seq_len, n_features, embedding_dim, num_layers = 8, 4, 32, 2
    key = jax.random.PRNGKey(0)
    k_w, k_x = jax.random.split(key)

    enc = EncoderPallas(seq_len, n_features, embedding_dim, num_layers,
                        dropout=0.0, bidirectional=False, key=k_w)

    x = jax.random.normal(k_x, (seq_len, n_features), dtype=jnp.float32)

    hidden, cell = enc.forward(x)
    hidden, cell = jax.block_until_ready((hidden, cell))

    assert hidden.shape == (num_layers, 1, embedding_dim)
    assert cell.shape == (num_layers, 1, embedding_dim)

    h_ref, c_ref = lstm_reference(x, enc.params, seq_len, n_features, embedding_dim)
    np.testing.assert_allclose(np.asarray(hidden), np.asarray(h_ref),
                               rtol=1e-5, atol=1e-5)
    np.testing.assert_allclose(np.asarray(cell), np.asarray(c_ref),
                               rtol=1e-5, atol=1e-5)

    print("KERNEL_OK")
</pallas_src>

<mosaic_0001>
module attributes {stable_mosaic.version = 11 : i64} {
  func.func @encoder_kernel(%arg0: memref<8x4xf32, #tpu.memory_space<vmem>>, %arg1: memref<4x128xf32, #tpu.memory_space<vmem>>, %arg2: memref<1x32x128xf32, #tpu.memory_space<vmem>>, %arg3: memref<2x32x128xf32, #tpu.memory_space<vmem>>, %arg4: memref<2x1x128xf32, #tpu.memory_space<vmem>>, %arg5: memref<2x1x32xf32, #tpu.memory_space<vmem>>, %arg6: memref<2x1x32xf32, #tpu.memory_space<vmem>>) attributes {dimension_semantics = [], scalar_prefetch = 0 : i64, scratch_operands = 0 : i64, tpu.core_type = #tpu.core_type<tc>} {
    %c0 = arith.constant 0 : index
    %c0_0 = arith.constant 0 : index
    %0 = vector.load %arg0[%c0, %c0_0] : memref<8x4xf32, #tpu.memory_space<vmem>>, vector<8x4xf32>
    %c0_1 = arith.constant 0 : index
    %c0_2 = arith.constant 0 : index
    %1 = vector.load %arg1[%c0_1, %c0_2] : memref<4x128xf32, #tpu.memory_space<vmem>>, vector<4x128xf32>
    %c0_3 = arith.constant 0 : index
    %c0_4 = arith.constant 0 : index
    %c0_5 = arith.constant 0 : index
    %2 = vector.load %arg3[%c0_3, %c0_4, %c0_5] : memref<2x32x128xf32, #tpu.memory_space<vmem>>, vector<1x32x128xf32>
    %3 = vector.shape_cast %2 : vector<1x32x128xf32> to vector<32x128xf32>
    %c0_6 = arith.constant 0 : index
    %c0_7 = arith.constant 0 : index
    %c0_8 = arith.constant 0 : index
    %4 = vector.load %arg4[%c0_6, %c0_7, %c0_8] : memref<2x1x128xf32, #tpu.memory_space<vmem>>, vector<1x1x128xf32>
    %5 = vector.shape_cast %4 : vector<1x1x128xf32> to vector<1x128xf32>
    %cst = arith.constant dense<0.000000e+00> : vector<8x128xf32>
    %6 = tpu.matmul %0, %1, %cst {dimension_numbers = #tpu.dot_dimension_numbers<[1], [0], [0], [1], [0, 0, 1, 1], [], []>} : vector<8x4xf32>, vector<4x128xf32>, vector<8x128xf32> -> vector<8x128xf32>
    %7 = vector.broadcast %5 : vector<1x128xf32> to vector<8x128xf32>
    %8 = arith.addf %6, %7 : vector<8x128xf32>
    %cst_9 = arith.constant 0.000000e+00 : f32
    %9 = vector.broadcast %cst_9 : f32 to vector<1x32xf32>
    %cst_10 = arith.constant 0.000000e+00 : f32
    %10 = vector.broadcast %cst_10 : f32 to vector<1x32xf32>
    %11 = vector.extract_strided_slice %8 {offsets = [0, 0], sizes = [1, 128], strides = [1, 1]} : vector<8x128xf32> to vector<1x128xf32>
    %cst_11 = arith.constant dense<0.000000e+00> : vector<1x128xf32>
    %12 = tpu.matmul %9, %3, %cst_11 {dimension_numbers = #tpu.dot_dimension_numbers<[1], [0], [0], [1], [0, 0, 1, 1], [], []>} : vector<1x32xf32>, vector<32x128xf32>, vector<1x128xf32> -> vector<1x128xf32>
    %13 = arith.addf %11, %12 : vector<1x128xf32>
    %14 = vector.extract_strided_slice %13 {offsets = [0, 0], sizes = [1, 32], strides = [1, 1]} : vector<1x128xf32> to vector<1x32xf32>
    %15 = arith.negf %14 : vector<1x32xf32>
    %16 = math.exp %15 : vector<1x32xf32>
    %cst_12 = arith.constant 1.000000e+00 : f32
    %17 = vector.broadcast %cst_12 : f32 to vector<1x32xf32>
    %18 = arith.addf %17, %16 : vector<1x32xf32>
    %19 = arith.divf %17, %18 : vector<1x32xf32>
    %20 = vector.extract_strided_slice %13 {offsets = [0, 32], sizes = [1, 32], strides = [1, 1]} : vector<1x128xf32> to vector<1x32xf32>
    %21 = arith.negf %20 : vector<1x32xf32>
    %22 = math.exp %21 : vector<1x32xf32>
    %cst_13 = arith.constant 1.000000e+00 : f32
    %23 = vector.broadcast %cst_13 : f32 to vector<1x32xf32>
    %24 = arith.addf %23, %22 : vector<1x32xf32>
    %25 = arith.divf %23, %24 : vector<1x32xf32>
    %26 = vector.extract_strided_slice %13 {offsets = [0, 64], sizes = [1, 32], strides = [1, 1]} : vector<1x128xf32> to vector<1x32xf32>
    %27 = math.tanh %26 : vector<1x32xf32>
    %28 = vector.extract_strided_slice %13 {offsets = [0, 96], sizes = [1, 32], strides = [1, 1]} : vector<1x128xf32> to vector<1x32xf32>
    %29 = arith.negf %28 : vector<1x32xf32>
    %30 = math.exp %29 : vector<1x32xf32>
    %cst_14 = arith.constant 1.000000e+00 : f32
    %31 = vector.broadcast %cst_14 : f32 to vector<1x32xf32>
    %32 = arith.addf %31, %30 : vector<1x32xf32>
    %33 = arith.divf %31, %32 : vector<1x32xf32>
    %34 = arith.mulf %25, %10 : vector<1x32xf32>
    %35 = arith.mulf %19, %27 : vector<1x32xf32>
    %36 = arith.addf %34, %35 : vector<1x32xf32>
    %37 = math.tanh %36 : vector<1x32xf32>
    %38 = arith.mulf %33, %37 : vector<1x32xf32>
    %39 = vector.extract_strided_slice %8 {offsets = [1, 0], sizes = [1, 128], strides = [1, 1]} : vector<8x128xf32> to vector<1x128xf32>
    %cst_15 = arith.constant dense<0.000000e+00> : vector<1x128xf32>
    %40 = tpu.matmul %38, %3, %cst_15 {dimension_numbers = #tpu.dot_dimension_numbers<[1], [0], [0], [1], [0, 0, 1, 1], [], []>} : vector<1x32xf32>, vector<32x128xf32>, vector<1x128xf32> -> vector<1x128xf32>
    %41 = arith.addf %39, %40 : vector<1x128xf32>
    %42 = vector.extract_strided_slice %41 {offsets = [0, 0], sizes = [1, 32], strides = [1, 1]} : vector<1x128xf32> to vector<1x32xf32>
    %43 = arith.negf %42 : vector<1x32xf32>
    %44 = math.exp %43 : vector<1x32xf32>
    %cst_16 = arith.constant 1.000000e+00 : f32
    %45 = vector.broadcast %cst_16 : f32 to vector<1x32xf32>
    %46 = arith.addf %45, %44 : vector<1x32xf32>
    %47 = arith.divf %45, %46 : vector<1x32xf32>
    %48 = vector.extract_strided_slice %41 {offsets = [0, 32], sizes = [1, 32], strides = [1, 1]} : vector<1x128xf32> to vector<1x32xf32>
    %49 = arith.negf %48 : vector<1x32xf32>
    %50 = math.exp %49 : vector<1x32xf32>
    %cst_17 = arith.constant 1.000000e+00 : f32
    %51 = vector.broadcast %cst_17 : f32 to vector<1x32xf32>
    %52 = arith.addf %51, %50 : vector<1x32xf32>
    %53 = arith.divf %51, %52 : vector<1x32xf32>
    %54 = vector.extract_strided_slice %41 {offsets = [0, 64], sizes = [1, 32], strides = [1, 1]} : vector<1x128xf32> to vector<1x32xf32>
    %55 = math.tanh %54 : vector<1x32xf32>
    %56 = vector.extract_strided_slice %41 {offsets = [0, 96], sizes = [1, 32], strides = [1, 1]} : vector<1x128xf32> to vector<1x32xf32>
    %57 = arith.negf %56 : vector<1x32xf32>
    %58 = math.exp %57 : vector<1x32xf32>
    %cst_18 = arith.constant 1.000000e+00 : f32
    %59 = vector.broadcast %cst_18 : f32 to vector<1x32xf32>
    %60 = arith.addf %59, %58 : vector<1x32xf32>
    %61 = arith.divf %59, %60 : vector<1x32xf32>
    %62 = arith.mulf %53, %36 : vector<1x32xf32>
    %63 = arith.mulf %47, %55 : vector<1x32xf32>
    %64 = arith.addf %62, %63 : vector<1x32xf32>
    %65 = math.tanh %64 : vector<1x32xf32>
    %66 = arith.mulf %61, %65 : vector<1x32xf32>
    %67 = vector.extract_strided_slice %8 {offsets = [2, 0], sizes = [1, 128], strides = [1, 1]} : vector<8x128xf32> to vector<1x128xf32>
    %cst_19 = arith.constant dense<0.000000e+00> : vector<1x128xf32>
    %68 = tpu.matmul %66, %3, %cst_19 {dimension_numbers = #tpu.dot_dimension_numbers<[1], [0], [0], [1], [0, 0, 1, 1], [], []>} : vector<1x32xf32>, vector<32x128xf32>, vector<1x128xf32> -> vector<1x128xf32>
    %69 = arith.addf %67, %68 : vector<1x128xf32>
    %70 = vector.extract_strided_slice %69 {offsets = [0, 0], sizes = [1, 32], strides = [1, 1]} : vector<1x128xf32> to vector<1x32xf32>
    %71 = arith.negf %70 : vector<1x32xf32>
    %72 = math.exp %71 : vector<1x32xf32>
    %cst_20 = arith.constant 1.000000e+00 : f32
    %73 = vector.broadcast %cst_20 : f32 to vector<1x32xf32>
    %74 = arith.addf %73, %72 : vector<1x32xf32>
    %75 = arith.divf %73, %74 : vector<1x32xf32>
    %76 = vector.extract_strided_slice %69 {offsets = [0, 32], sizes = [1, 32], strides = [1, 1]} : vector<1x128xf32> to vector<1x32xf32>
    %77 = arith.negf %76 : vector<1x32xf32>
    %78 = math.exp %77 : vector<1x32xf32>
    %cst_21 = arith.constant 1.000000e+00 : f32
    %79 = vector.broadcast %cst_21 : f32 to vector<1x32xf32>
    %80 = arith.addf %79, %78 : vector<1x32xf32>
    %81 = arith.divf %79, %80 : vector<1x32xf32>
    %82 = vector.extract_strided_slice %69 {offsets = [0, 64], sizes = [1, 32], strides = [1, 1]} : vector<1x128xf32> to vector<1x32xf32>
    %83 = math.tanh %82 : vector<1x32xf32>
    %84 = vector.extract_strided_slice %69 {offsets = [0, 96], sizes = [1, 32], strides = [1, 1]} : vector<1x128xf32> to vector<1x32xf32>
    %85 = arith.negf %84 : vector<1x32xf32>
    %86 = math.exp %85 : vector<1x32xf32>
    %cst_22 = arith.constant 1.000000e+00 : f32
    %87 = vector.broadcast %cst_22 : f32 to vector<1x32xf32>
    %88 = arith.addf %87, %86 : vector<1x32xf32>
    %89 = arith.divf %87, %88 : vector<1x32xf32>
    %90 = arith.mulf %81, %64 : vector<1x32xf32>
    %91 = arith.mulf %75, %83 : vector<1x32xf32>
    %92 = arith.addf %90, %91 : vector<1x32xf32>
    %93 = math.tanh %92 : vector<1x32xf32>
    %94 = arith.mulf %89, %93 : vector<1x32xf32>
    %95 = vector.extract_strided_slice %8 {offsets = [3, 0], sizes = [1, 128], strides = [1, 1]} : vector<8x128xf32> to vector<1x128xf32>
    %cst_23 = arith.constant dense<0.000000e+00> : vector<1x128xf32>
    %96 = tpu.matmul %94, %3, %cst_23 {dimension_numbers = #tpu.dot_dimension_numbers<[1], [0], [0], [1], [0, 0, 1, 1], [], []>} : vector<1x32xf32>, vector<32x128xf32>, vector<1x128xf32> -> vector<1x128xf32>
    %97 = arith.addf %95, %96 : vector<1x128xf32>
    %98 = vector.extract_strided_slice %97 {offsets = [0, 0], sizes = [1, 32], strides = [1, 1]} : vector<1x128xf32> to vector<1x32xf32>
    %99 = arith.negf %98 : vector<1x32xf32>
    %100 = math.exp %99 : vector<1x32xf32>
    %cst_24 = arith.constant 1.000000e+00 : f32
    %101 = vector.broadcast %cst_24 : f32 to vector<1x32xf32>
    %102 = arith.addf %101, %100 : vector<1x32xf32>
    %103 = arith.divf %101, %102 : vector<1x32xf32>
    %104 = vector.extract_strided_slice %97 {offsets = [0, 32], sizes = [1, 32], strides = [1, 1]} : vector<1x128xf32> to vector<1x32xf32>
    %105 = arith.negf %104 : vector<1x32xf32>
    %106 = math.exp %105 : vector<1x32xf32>
    %cst_25 = arith.constant 1.000000e+00 : f32
    %107 = vector.broadcast %cst_25 : f32 to vector<1x32xf32>
    %108 = arith.addf %107, %106 : vector<1x32xf32>
    %109 = arith.divf %107, %108 : vector<1x32xf32>
    %110 = vector.extract_strided_slice %97 {offsets = [0, 64], sizes = [1, 32], strides = [1, 1]} : vector<1x128xf32> to vector<1x32xf32>
    %111 = math.tanh %110 : vector<1x32xf32>
    %112 = vector.extract_strided_slice %97 {offsets = [0, 96], sizes = [1, 32], strides = [1, 1]} : vector<1x128xf32> to vector<1x32xf32>
    %113 = arith.negf %112 : vector<1x32xf32>
    %114 = math.exp %113 : vector<1x32xf32>
    %cst_26 = arith.constant 1.000000e+00 : f32
    %115 = vector.broadcast %cst_26 : f32 to vector<1x32xf32>
    %116 = arith.addf %115, %114 : vector<1x32xf32>
    %117 = arith.divf %115, %116 : vector<1x32xf32>
    %118 = arith.mulf %109, %92 : vector<1x32xf32>
    %119 = arith.mulf %103, %111 : vector<1x32xf32>
    %120 = arith.addf %118, %119 : vector<1x32xf32>
    %121 = math.tanh %120 : vector<1x32xf32>
    %122 = arith.mulf %117, %121 : vector<1x32xf32>
    %123 = vector.extract_strided_slice %8 {offsets = [4, 0], sizes = [1, 128], strides = [1, 1]} : vector<8x128xf32> to vector<1x128xf32>
    %cst_27 = arith.constant dense<0.000000e+00> : vector<1x128xf32>
    %124 = tpu.matmul %122, %3, %cst_27 {dimension_numbers = #tpu.dot_dimension_numbers<[1], [0], [0], [1], [0, 0, 1, 1], [], []>} : vector<1x32xf32>, vector<32x128xf32>, vector<1x128xf32> -> vector<1x128xf32>
    %125 = arith.addf %123, %124 : vector<1x128xf32>
    %126 = vector.extract_strided_slice %125 {offsets = [0, 0], sizes = [1, 32], strides = [1, 1]} : vector<1x128xf32> to vector<1x32xf32>
    %127 = arith.negf %126 : vector<1x32xf32>
    %128 = math.exp %127 : vector<1x32xf32>
    %cst_28 = arith.constant 1.000000e+00 : f32
    %129 = vector.broadcast %cst_28 : f32 to vector<1x32xf32>
    %130 = arith.addf %129, %128 : vector<1x32xf32>
    %131 = arith.divf %129, %130 : vector<1x32xf32>
    %132 = vector.extract_strided_slice %125 {offsets = [0, 32], sizes = [1, 32], strides = [1, 1]} : vector<1x128xf32> to vector<1x32xf32>
    %133 = arith.negf %132 : vector<1x32xf32>
    %134 = math.exp %133 : vector<1x32xf32>
    %cst_29 = arith.constant 1.000000e+00 : f32
    %135 = vector.broadcast %cst_29 : f32 to vector<1x32xf32>
    %136 = arith.addf %135, %134 : vector<1x32xf32>
    %137 = arith.divf %135, %136 : vector<1x32xf32>
    %138 = vector.extract_strided_slice %125 {offsets = [0, 64], sizes = [1, 32], strides = [1, 1]} : vector<1x128xf32> to vector<1x32xf32>
    %139 = math.tanh %138 : vector<1x32xf32>
    %140 = vector.extract_strided_slice %125 {offsets = [0, 96], sizes = [1, 32], strides = [1, 1]} : vector<1x128xf32> to vector<1x32xf32>
    %141 = arith.negf %140 : vector<1x32xf32>
    %142 = math.exp %141 : vector<1x32xf32>
    %cst_30 = arith.constant 1.000000e+00 : f32
    %143 = vector.broadcast %cst_30 : f32 to vector<1x32xf32>
    %144 = arith.addf %143, %142 : vector<1x32xf32>
    %145 = arith.divf %143, %144 : vector<1x32xf32>
    %146 = arith.mulf %137, %120 : vector<1x32xf32>
    %147 = arith.mulf %131, %139 : vector<1x32xf32>
    %148 = arith.addf %146, %147 : vector<1x32xf32>
    %149 = math.tanh %148 : vector<1x32xf32>
    %150 = arith.mulf %145, %149 : vector<1x32xf32>
    %151 = vector.extract_strided_slice %8 {offsets = [5, 0], sizes = [1, 128], strides = [1, 1]} : vector<8x128xf32> to vector<1x128xf32>
    %cst_31 = arith.constant dense<0.000000e+00> : vector<1x128xf32>
    %152 = tpu.matmul %150, %3, %cst_31 {dimension_numbers = #tpu.dot_dimension_numbers<[1], [0], [0], [1], [0, 0, 1, 1], [], []>} : vector<1x32xf32>, vector<32x128xf32>, vector<1x128xf32> -> vector<1x128xf32>
    %153 = arith.addf %151, %152 : vector<1x128xf32>
    %154 = vector.extract_strided_slice %153 {offsets = [0, 0], sizes = [1, 32], strides = [1, 1]} : vector<1x128xf32> to vector<1x32xf32>
    %155 = arith.negf %154 : vector<1x32xf32>
    %156 = math.exp %155 : vector<1x32xf32>
    %cst_32 = arith.constant 1.000000e+00 : f32
    %157 = vector.broadcast %cst_32 : f32 to vector<1x32xf32>
    %158 = arith.addf %157, %156 : vector<1x32xf32>
    %159 = arith.divf %157, %158 : vector<1x32xf32>
    %160 = vector.extract_strided_slice %153 {offsets = [0, 32], sizes = [1, 32], strides = [1, 1]} : vector<1x128xf32> to vector<1x32xf32>
    %161 = arith.negf %160 : vector<1x32xf32>
    %162 = math.exp %161 : vector<1x32xf32>
    %cst_33 = arith.constant 1.000000e+00 : f32
    %163 = vector.broadcast %cst_33 : f32 to vector<1x32xf32>
    %164 = arith.addf %163, %162 : vector<1x32xf32>
    %165 = arith.divf %163, %164 : vector<1x32xf32>
    %166 = vector.extract_strided_slice %153 {offsets = [0, 64], sizes = [1, 32], strides = [1, 1]} : vector<1x128xf32> to vector<1x32xf32>
    %167 = math.tanh %166 : vector<1x32xf32>
    %168 = vector.extract_strided_slice %153 {offsets = [0, 96], sizes = [1, 32], strides = [1, 1]} : vector<1x128xf32> to vector<1x32xf32>
    %169 = arith.negf %168 : vector<1x32xf32>
    %170 = math.exp %169 : vector<1x32xf32>
    %cst_34 = arith.constant 1.000000e+00 : f32
    %171 = vector.broadcast %cst_34 : f32 to vector<1x32xf32>
    %172 = arith.addf %171, %170 : vector<1x32xf32>
    %173 = arith.divf %171, %172 : vector<1x32xf32>
    %174 = arith.mulf %165, %148 : vector<1x32xf32>
    %175 = arith.mulf %159, %167 : vector<1x32xf32>
    %176 = arith.addf %174, %175 : vector<1x32xf32>
    %177 = math.tanh %176 : vector<1x32xf32>
    %178 = arith.mulf %173, %177 : vector<1x32xf32>
    %179 = vector.extract_strided_slice %8 {offsets = [6, 0], sizes = [1, 128], strides = [1, 1]} : vector<8x128xf32> to vector<1x128xf32>
    %cst_35 = arith.constant dense<0.000000e+00> : vector<1x128xf32>
    %180 = tpu.matmul %178, %3, %cst_35 {dimension_numbers = #tpu.dot_dimension_numbers<[1], [0], [0], [1], [0, 0, 1, 1], [], []>} : vector<1x32xf32>, vector<32x128xf32>, vector<1x128xf32> -> vector<1x128xf32>
    %181 = arith.addf %179, %180 : vector<1x128xf32>
    %182 = vector.extract_strided_slice %181 {offsets = [0, 0], sizes = [1, 32], strides = [1, 1]} : vector<1x128xf32> to vector<1x32xf32>
    %183 = arith.negf %182 : vector<1x32xf32>
    %184 = math.exp %183 : vector<1x32xf32>
    %cst_36 = arith.constant 1.000000e+00 : f32
    %185 = vector.broadcast %cst_36 : f32 to vector<1x32xf32>
    %186 = arith.addf %185, %184 : vector<1x32xf32>
    %187 = arith.divf %185, %186 : vector<1x32xf32>
    %188 = vector.extract_strided_slice %181 {offsets = [0, 32], sizes = [1, 32], strides = [1, 1]} : vector<1x128xf32> to vector<1x32xf32>
    %189 = arith.negf %188 : vector<1x32xf32>
    %190 = math.exp %189 : vector<1x32xf32>
    %cst_37 = arith.constant 1.000000e+00 : f32
    %191 = vector.broadcast %cst_37 : f32 to vector<1x32xf32>
    %192 = arith.addf %191, %190 : vector<1x32xf32>
    %193 = arith.divf %191, %192 : vector<1x32xf32>
    %194 = vector.extract_strided_slice %181 {offsets = [0, 64], sizes = [1, 32], strides = [1, 1]} : vector<1x128xf32> to vector<1x32xf32>
    %195 = math.tanh %194 : vector<1x32xf32>
    %196 = vector.extract_strided_slice %181 {offsets = [0, 96], sizes = [1, 32], strides = [1, 1]} : vector<1x128xf32> to vector<1x32xf32>
    %197 = arith.negf %196 : vector<1x32xf32>
    %198 = math.exp %197 : vector<1x32xf32>
    %cst_38 = arith.constant 1.000000e+00 : f32
    %199 = vector.broadcast %cst_38 : f32 to vector<1x32xf32>
    %200 = arith.addf %199, %198 : vector<1x32xf32>
    %201 = arith.divf %199, %200 : vector<1x32xf32>
    %202 = arith.mulf %193, %176 : vector<1x32xf32>
    %203 = arith.mulf %187, %195 : vector<1x32xf32>
    %204 = arith.addf %202, %203 : vector<1x32xf32>
    %205 = math.tanh %204 : vector<1x32xf32>
    %206 = arith.mulf %201, %205 : vector<1x32xf32>
    %207 = vector.extract_strided_slice %8 {offsets = [7, 0], sizes = [1, 128], strides = [1, 1]} : vector<8x128xf32> to vector<1x128xf32>
    %cst_39 = arith.constant dense<0.000000e+00> : vector<1x128xf32>
    %208 = tpu.matmul %206, %3, %cst_39 {dimension_numbers = #tpu.dot_dimension_numbers<[1], [0], [0], [1], [0, 0, 1, 1], [], []>} : vector<1x32xf32>, vector<32x128xf32>, vector<1x128xf32> -> vector<1x128xf32>
    %209 = arith.addf %207, %208 : vector<1x128xf32>
    %210 = vector.extract_strided_slice %209 {offsets = [0, 0], sizes = [1, 32], strides = [1, 1]} : vector<1x128xf32> to vector<1x32xf32>
    %211 = arith.negf %210 : vector<1x32xf32>
    %212 = math.exp %211 : vector<1x32xf32>
    %cst_40 = arith.constant 1.000000e+00 : f32
    %213 = vector.broadcast %cst_40 : f32 to vector<1x32xf32>
    %214 = arith.addf %213, %212 : vector<1x32xf32>
    %215 = arith.divf %213, %214 : vector<1x32xf32>
    %216 = vector.extract_strided_slice %209 {offsets = [0, 32], sizes = [1, 32], strides = [1, 1]} : vector<1x128xf32> to vector<1x32xf32>
    %217 = arith.negf %216 : vector<1x32xf32>
    %218 = math.exp %217 : vector<1x32xf32>
    %cst_41 = arith.constant 1.000000e+00 : f32
    %219 = vector.broadcast %cst_41 : f32 to vector<1x32xf32>
    %220 = arith.addf %219, %218 : vector<1x32xf32>
    %221 = arith.divf %219, %220 : vector<1x32xf32>
    %222 = vector.extract_strided_slice %209 {offsets = [0, 64], sizes = [1, 32], strides = [1, 1]} : vector<1x128xf32> to vector<1x32xf32>
    %223 = math.tanh %222 : vector<1x32xf32>
    %224 = vector.extract_strided_slice %209 {offsets = [0, 96], sizes = [1, 32], strides = [1, 1]} : vector<1x128xf32> to vector<1x32xf32>
    %225 = arith.negf %224 : vector<1x32xf32>
    %226 = math.exp %225 : vector<1x32xf32>
    %cst_42 = arith.constant 1.000000e+00 : f32
    %227 = vector.broadcast %cst_42 : f32 to vector<1x32xf32>
    %228 = arith.addf %227, %226 : vector<1x32xf32>
    %229 = arith.divf %227, %228 : vector<1x32xf32>
    %230 = arith.mulf %221, %204 : vector<1x32xf32>
    %231 = arith.mulf %215, %223 : vector<1x32xf32>
    %232 = arith.addf %230, %231 : vector<1x32xf32>
    %233 = math.tanh %232 : vector<1x32xf32>
    %234 = arith.mulf %229, %233 : vector<1x32xf32>
    %c0_43 = arith.constant 0 : index
    %c0_44 = arith.constant 0 : index
    %c0_45 = arith.constant 0 : index
    %235 = vector.load %arg5[%c0_43, %c0_44, %c0_45] : memref<2x1x32xf32, #tpu.memory_space<vmem>>, vector<1x1x32xf32>
    %236 = vector.shape_cast %235 : vector<1x1x32xf32> to vector<1x32xf32>
    %237 = vector.shape_cast %234 : vector<1x32xf32> to vector<1x1x32xf32>
    tpu.vector_store %arg5[%c0_43, %c0_44, %c0_45], %237 {strides = array<i32>} : memref<2x1x32xf32, #tpu.memory_space<vmem>>, vector<1x1x32xf32>,
    %c0_46 = arith.constant 0 : index
    %c0_47 = arith.constant 0 : index
    %c0_48 = arith.constant 0 : index
    %238 = vector.load %arg6[%c0_46, %c0_47, %c0_48] : memref<2x1x32xf32, #tpu.memory_space<vmem>>, vector<1x1x32xf32>
    %239 = vector.shape_cast %238 : vector<1x1x32xf32> to vector<1x32xf32>
    %240 = vector.shape_cast %232 : vector<1x32xf32> to vector<1x1x32xf32>
    tpu.vector_store %arg6[%c0_46, %c0_47, %c0_48], %240 {strides = array<i32>} : memref<2x1x32xf32, #tpu.memory_space<vmem>>, vector<1x1x32xf32>,
    %241 = tpu.concatenate %38, %66, %94, %122, %150, %178, %206, %234 in 0 : vector<1x32xf32>, vector<1x32xf32>, vector<1x32xf32>, vector<1x32xf32>, vector<1x32xf32>, vector<1x32xf32>, vector<1x32xf32>, vector<1x32xf32> -> vector<8x32xf32>
    %c0_49 = arith.constant 0 : index
    %c0_50 = arith.constant 0 : index
    %c0_51 = arith.constant 0 : index
    %242 = vector.load %arg2[%c0_49, %c0_50, %c0_51] : memref<1x32x128xf32, #tpu.memory_space<vmem>>, vector<1x32x128xf32>
    %243 = vector.shape_cast %242 : vector<1x32x128xf32> to vector<32x128xf32>
    %c1 = arith.constant 1 : index
    %c0_52 = arith.constant 0 : index
    %c0_53 = arith.constant 0 : index
    %244 = vector.load %arg3[%c1, %c0_52, %c0_53] : memref<2x32x128xf32, #tpu.memory_space<vmem>>, vector<1x32x128xf32>
    %245 = vector.shape_cast %244 : vector<1x32x128xf32> to vector<32x128xf32>
    %c1_54 = arith.constant 1 : index
    %c0_55 = arith.constant 0 : index
    %c0_56 = arith.constant 0 : index
    %246 = vector.load %arg4[%c1_54, %c0_55, %c0_56] : memref<2x1x128xf32, #tpu.memory_space<vmem>>, vector<1x1x128xf32>
    %247 = vector.shape_cast %246 : vector<1x1x128xf32> to vector<1x128xf32>
    %cst_57 = arith.constant dense<0.000000e+00> : vector<8x128xf32>
    %248 = tpu.matmul %241, %243, %cst_57 {dimension_numbers = #tpu.dot_dimension_numbers<[1], [0], [0], [1], [0, 0, 1, 1], [], []>} : vector<8x32xf32>, vector<32x128xf32>, vector<8x128xf32> -> vector<8x128xf32>
    %249 = vector.broadcast %247 : vector<1x128xf32> to vector<8x128xf32>
    %250 = arith.addf %248, %249 : vector<8x128xf32>
    %cst_58 = arith.constant 0.000000e+00 : f32
    %251 = vector.broadcast %cst_58 : f32 to vector<1x32xf32>
    %cst_59 = arith.constant 0.000000e+00 : f32
    %252 = vector.broadcast %cst_59 : f32 to vector<1x32xf32>
    %253 = vector.extract_strided_slice %250 {offsets = [0, 0], sizes = [1, 128], strides = [1, 1]} : vector<8x128xf32> to vector<1x128xf32>
    %cst_60 = arith.constant dense<0.000000e+00> : vector<1x128xf32>
    %254 = tpu.matmul %251, %245, %cst_60 {dimension_numbers = #tpu.dot_dimension_numbers<[1], [0], [0], [1], [0, 0, 1, 1], [], []>} : vector<1x32xf32>, vector<32x128xf32>, vector<1x128xf32> -> vector<1x128xf32>
    %255 = arith.addf %253, %254 : vector<1x128xf32>
    %256 = vector.extract_strided_slice %255 {offsets = [0, 0], sizes = [1, 32], strides = [1, 1]} : vector<1x128xf32> to vector<1x32xf32>
    %257 = arith.negf %256 : vector<1x32xf32>
    %258 = math.exp %257 : vector<1x32xf32>
    %cst_61 = arith.constant 1.000000e+00 : f32
    %259 = vector.broadcast %cst_61 : f32 to vector<1x32xf32>
    %260 = arith.addf %259, %258 : vector<1x32xf32>
    %261 = arith.divf %259, %260 : vector<1x32xf32>
    %262 = vector.extract_strided_slice %255 {offsets = [0, 32], sizes = [1, 32], strides = [1, 1]} : vector<1x128xf32> to vector<1x32xf32>
    %263 = arith.negf %262 : vector<1x32xf32>
    %264 = math.exp %263 : vector<1x32xf32>
    %cst_62 = arith.constant 1.000000e+00 : f32
    %265 = vector.broadcast %cst_62 : f32 to vector<1x32xf32>
    %266 = arith.addf %265, %264 : vector<1x32xf32>
    %267 = arith.divf %265, %266 : vector<1x32xf32>
    %268 = vector.extract_strided_slice %255 {offsets = [0, 64], sizes = [1, 32], strides = [1, 1]} : vector<1x128xf32> to vector<1x32xf32>
    %269 = math.tanh %268 : vector<1x32xf32>
    %270 = vector.extract_strided_slice %255 {offsets = [0, 96], sizes = [1, 32], strides = [1, 1]} : vector<1x128xf32> to vector<1x32xf32>
    %271 = arith.negf %270 : vector<1x32xf32>
    %272 = math.exp %271 : vector<1x32xf32>
    %cst_63 = arith.constant 1.000000e+00 : f32
    %273 = vector.broadcast %cst_63 : f32 to vector<1x32xf32>
    %274 = arith.addf %273, %272 : vector<1x32xf32>
    %275 = arith.divf %273, %274 : vector<1x32xf32>
    %276 = arith.mulf %267, %252 : vector<1x32xf32>
    %277 = arith.mulf %261, %269 : vector<1x32xf32>
    %278 = arith.addf %276, %277 : vector<1x32xf32>
    %279 = math.tanh %278 : vector<1x32xf32>
    %280 = arith.mulf %275, %279 : vector<1x32xf32>
    %281 = vector.extract_strided_slice %250 {offsets = [1, 0], sizes = [1, 128], strides = [1, 1]} : vector<8x128xf32> to vector<1x128xf32>
    %cst_64 = arith.constant dense<0.000000e+00> : vector<1x128xf32>
    %282 = tpu.matmul %280, %245, %cst_64 {dimension_numbers = #tpu.dot_dimension_numbers<[1], [0], [0], [1], [0, 0, 1, 1], [], []>} : vector<1x32xf32>, vector<32x128xf32>, vector<1x128xf32> -> vector<1x128xf32>
    %283 = arith.addf %281, %282 : vector<1x128xf32>
    %284 = vector.extract_strided_slice %283 {offsets = [0, 0], sizes = [1, 32], strides = [1, 1]} : vector<1x128xf32> to vector<1x32xf32>
    %285 = arith.negf %284 : vector<1x32xf32>
    %286 = math.exp %285 : vector<1x32xf32>
    %cst_65 = arith.constant 1.000000e+00 : f32
    %287 = vector.broadcast %cst_65 : f32 to vector<1x32xf32>
    %288 = arith.addf %287, %286 : vector<1x32xf32>
    %289 = arith.divf %287, %288 : vector<1x32xf32>
    %290 = vector.extract_strided_slice %283 {offsets = [0, 32], sizes = [1, 32], strides = [1, 1]} : vector<1x128xf32> to vector<1x32xf32>
    %291 = arith.negf %290 : vector<1x32xf32>
    %292 = math.exp %291 : vector<1x32xf32>
    %cst_66 = arith.constant 1.000000e+00 : f32
    %293 = vector.broadcast %cst_66 : f32 to vector<1x32xf32>
    %294 = arith.addf %293, %292 : vector<1x32xf32>
    %295 = arith.divf %293, %294 : vector<1x32xf32>
    %296 = vector.extract_strided_slice %283 {offsets = [0, 64], sizes = [1, 32], strides = [1, 1]} : vector<1x128xf32> to vector<1x32xf32>
    %297 = math.tanh %296 : vector<1x32xf32>
    %298 = vector.extract_strided_slice %283 {offsets = [0, 96], sizes = [1, 32], strides = [1, 1]} : vector<1x128xf32> to vector<1x32xf32>
    %299 = arith.negf %298 : vector<1x32xf32>
    %300 = math.exp %299 : vector<1x32xf32>
    %cst_67 = arith.constant 1.000000e+00 : f32
    %301 = vector.broadcast %cst_67 : f32 to vector<1x32xf32>
    %302 = arith.addf %301, %300 : vector<1x32xf32>
    %303 = arith.divf %301, %302 : vector<1x32xf32>
    %304 = arith.mulf %295, %278 : vector<1x32xf32>
    %305 = arith.mulf %289, %297 : vector<1x32xf32>
    %306 = arith.addf %304, %305 : vector<1x32xf32>
    %307 = math.tanh %306 : vector<1x32xf32>
    %308 = arith.mulf %303, %307 : vector<1x32xf32>
    %309 = vector.extract_strided_slice %250 {offsets = [2, 0], sizes = [1, 128], strides = [1, 1]} : vector<8x128xf32> to vector<1x128xf32>
    %cst_68 = arith.constant dense<0.000000e+00> : vector<1x128xf32>
    %310 = tpu.matmul %308, %245, %cst_68 {dimension_numbers = #tpu.dot_dimension_numbers<[1], [0], [0], [1], [0, 0, 1, 1], [], []>} : vector<1x32xf32>, vector<32x128xf32>, vector<1x128xf32> -> vector<1x128xf32>
    %311 = arith.addf %309, %310 : vector<1x128xf32>
    %312 = vector.extract_strided_slice %311 {offsets = [0, 0], sizes = [1, 32], strides = [1, 1]} : vector<1x128xf32> to vector<1x32xf32>
    %313 = arith.negf %312 : vector<1x32xf32>
    %314 = math.exp %313 : vector<1x32xf32>
    %cst_69 = arith.constant 1.000000e+00 : f32
    %315 = vector.broadcast %cst_69 : f32 to vector<1x32xf32>
    %316 = arith.addf %315, %314 : vector<1x32xf32>
    %317 = arith.divf %315, %316 : vector<1x32xf32>
    %318 = vector.extract_strided_slice %311 {offsets = [0, 32], sizes = [1, 32], strides = [1, 1]} : vector<1x128xf32> to vector<1x32xf32>
    %319 = arith.negf %318 : vector<1x32xf32>
    %320 = math.exp %319 : vector<1x32xf32>
    %cst_70 = arith.constant 1.000000e+00 : f32
    %321 = vector.broadcast %cst_70 : f32 to vector<1x32xf32>
    %322 = arith.addf %321, %320 : vector<1x32xf32>
    %323 = arith.divf %321, %322 : vector<1x32xf32>
    %324 = vector.extract_strided_slice %311 {offsets = [0, 64], sizes = [1, 32], strides = [1, 1]} : vector<1x128xf32> to vector<1x32xf32>
    %325 = math.tanh %324 : vector<1x32xf32>
    %326 = vector.extract_strided_slice %311 {offsets = [0, 96], sizes = [1, 32], strides = [1, 1]} : vector<1x128xf32> to vector<1x32xf32>
    %327 = arith.negf %326 : vector<1x32xf32>
    %328 = math.exp %327 : vector<1x32xf32>
    %cst_71 = arith.constant 1.000000e+00 : f32
    %329 = vector.broadcast %cst_71 : f32 to vector<1x32xf32>
    %330 = arith.addf %329, %328 : vector<1x32xf32>
    %331 = arith.divf %329, %330 : vector<1x32xf32>
    %332 = arith.mulf %323, %306 : vector<1x32xf32>
    %333 = arith.mulf %317, %325 : vector<1x32xf32>
    %334 = arith.addf %332, %333 : vector<1x32xf32>
    %335 = math.tanh %334 : vector<1x32xf32>
    %336 = arith.mulf %331, %335 : vector<1x32xf32>
    %337 = vector.extract_strided_slice %250 {offsets = [3, 0], sizes = [1, 128], strides = [1, 1]} : vector<8x128xf32> to vector<1x128xf32>
    %cst_72 = arith.constant dense<0.000000e+00> : vector<1x128xf32>
    %338 = tpu.matmul %336, %245, %cst_72 {dimension_numbers = #tpu.dot_dimension_numbers<[1], [0], [0], [1], [0, 0, 1, 1], [], []>} : vector<1x32xf32>, vector<32x128xf32>, vector<1x128xf32> -> vector<1x128xf32>
    %339 = arith.addf %337, %338 : vector<1x128xf32>
    %340 = vector.extract_strided_slice %339 {offsets = [0, 0], sizes = [1, 32], strides = [1, 1]} : vector<1x128xf32> to vector<1x32xf32>
    %341 = arith.negf %340 : vector<1x32xf32>
    %342 = math.exp %341 : vector<1x32xf32>
    %cst_73 = arith.constant 1.000000e+00 : f32
    %343 = vector.broadcast %cst_73 : f32 to vector<1x32xf32>
    %344 = arith.addf %343, %342 : vector<1x32xf32>
    %345 = arith.divf %343, %344 : vector<1x32xf32>
    %346 = vector.extract_strided_slice %339 {offsets = [0, 32], sizes = [1, 32], strides = [1, 1]} : vector<1x128xf32> to vector<1x32xf32>
    %347 = arith.negf %346 : vector<1x32xf32>
    %348 = math.exp %347 : vector<1x32xf32>
    %cst_74 = arith.constant 1.000000e+00 : f32
    %349 = vector.broadcast %cst_74 : f32 to vector<1x32xf32>
    %350 = arith.addf %349, %348 : vector<1x32xf32>
    %351 = arith.divf %349, %350 : vector<1x32xf32>
    %352 = vector.extract_strided_slice %339 {offsets = [0, 64], sizes = [1, 32], strides = [1, 1]} : vector<1x128xf32> to vector<1x32xf32>
    %353 = math.tanh %352 : vector<1x32xf32>
    %354 = vector.extract_strided_slice %339 {offsets = [0, 96], sizes = [1, 32], strides = [1, 1]} : vector<1x128xf32> to vector<1x32xf32>
    %355 = arith.negf %354 : vector<1x32xf32>
    %356 = math.exp %355 : vector<1x32xf32>
    %cst_75 = arith.constant 1.000000e+00 : f32
    %357 = vector.broadcast %cst_75 : f32 to vector<1x32xf32>
    %358 = arith.addf %357, %356 : vector<1x32xf32>
    %359 = arith.divf %357, %358 : vector<1x32xf32>
    %360 = arith.mulf %351, %334 : vector<1x32xf32>
    %361 = arith.mulf %345, %353 : vector<1x32xf32>
    %362 = arith.addf %360, %361 : vector<1x32xf32>
    %363 = math.tanh %362 : vector<1x32xf32>
    %364 = arith.mulf %359, %363 : vector<1x32xf32>
    %365 = vector.extract_strided_slice %250 {offsets = [4, 0], sizes = [1, 128], strides = [1, 1]} : vector<8x128xf32> to vector<1x128xf32>
    %cst_76 = arith.constant dense<0.000000e+00> : vector<1x128xf32>
    %366 = tpu.matmul %364, %245, %cst_76 {dimension_numbers = #tpu.dot_dimension_numbers<[1], [0], [0], [1], [0, 0, 1, 1], [], []>} : vector<1x32xf32>, vector<32x128xf32>, vector<1x128xf32> -> vector<1x128xf32>
    %367 = arith.addf %365, %366 : vector<1x128xf32>
    %368 = vector.extract_strided_slice %367 {offsets = [0, 0], sizes = [1, 32], strides = [1, 1]} : vector<1x128xf32> to vector<1x32xf32>
    %369 = arith.negf %368 : vector<1x32xf32>
    %370 = math.exp %369 : vector<1x32xf32>
    %cst_77 = arith.constant 1.000000e+00 : f32
    %371 = vector.broadcast %cst_77 : f32 to vector<1x32xf32>
    %372 = arith.addf %371, %370 : vector<1x32xf32>
    %373 = arith.divf %371, %372 : vector<1x32xf32>
    %374 = vector.extract_strided_slice %367 {offsets = [0, 32], sizes = [1, 32], strides = [1, 1]} : vector<1x128xf32> to vector<1x32xf32>
    %375 = arith.negf %374 : vector<1x32xf32>
    %376 = math.exp %375 : vector<1x32xf32>
    %cst_78 = arith.constant 1.000000e+00 : f32
    %377 = vector.broadcast %cst_78 : f32 to vector<1x32xf32>
    %378 = arith.addf %377, %376 : vector<1x32xf32>
    %379 = arith.divf %377, %378 : vector<1x32xf32>
    %380 = vector.extract_strided_slice %367 {offsets = [0, 64], sizes = [1, 32], strides = [1, 1]} : vector<1x128xf32> to vector<1x32xf32>
    %381 = math.tanh %380 : vector<1x32xf32>
    %382 = vector.extract_strided_slice %367 {offsets = [0, 96], sizes = [1, 32], strides = [1, 1]} : vector<1x128xf32> to vector<1x32xf32>
    %383 = arith.negf %382 : vector<1x32xf32>
    %384 = math.exp %383 : vector<1x32xf32>
    %cst_79 = arith.constant 1.000000e+00 : f32
    %385 = vector.broadcast %cst_79 : f32 to vector<1x32xf32>
    %386 = arith.addf %385, %384 : vector<1x32xf32>
    %387 = arith.divf %385, %386 : vector<1x32xf32>
    %388 = arith.mulf %379, %362 : vector<1x32xf32>
    %389 = arith.mulf %373, %381 : vector<1x32xf32>
    %390 = arith.addf %388, %389 : vector<1x32xf32>
    %391 = math.tanh %390 : vector<1x32xf32>
    %392 = arith.mulf %387, %391 : vector<1x32xf32>
    %393 = vector.extract_strided_slice %250 {offsets = [5, 0], sizes = [1, 128], strides = [1, 1]} : vector<8x128xf32> to vector<1x128xf32>
    %cst_80 = arith.constant dense<0.000000e+00> : vector<1x128xf32>
    %394 = tpu.matmul %392, %245, %cst_80 {dimension_numbers = #tpu.dot_dimension_numbers<[1], [0], [0], [1], [0, 0, 1, 1], [], []>} : vector<1x32xf32>, vector<32x128xf32>, vector<1x128xf32> -> vector<1x128xf32>
    %395 = arith.addf %393, %394 : vector<1x128xf32>
    %396 = vector.extract_strided_slice %395 {offsets = [0, 0], sizes = [1, 32], strides = [1, 1]} : vector<1x128xf32> to vector<1x32xf32>
    %397 = arith.negf %396 : vector<1x32xf32>
    %398 = math.exp %397 : vector<1x32xf32>
    %cst_81 = arith.constant 1.000000e+00 : f32
    %399 = vector.broadcast %cst_81 : f32 to vector<1x32xf32>
    %400 = arith.addf %399, %398 : vector<1x32xf32>
    %401 = arith.divf %399, %400 : vector<1x32xf32>
    %402 = vector.extract_strided_slice %395 {offsets = [0, 32], sizes = [1, 32], strides = [1, 1]} : vector<1x128xf32> to vector<1x32xf32>
    %403 = arith.negf %402 : vector<1x32xf32>
    %404 = math.exp %403 : vector<1x32xf32>
    %cst_82 = arith.constant 1.000000e+00 : f32
    %405 = vector.broadcast %cst_82 : f32 to vector<1x32xf32>
    %406 = arith.addf %405, %404 : vector<1x32xf32>
    %407 = arith.divf %405, %406 : vector<1x32xf32>
    %408 = vector.extract_strided_slice %395 {offsets = [0, 64], sizes = [1, 32], strides = [1, 1]} : vector<1x128xf32> to vector<1x32xf32>
    %409 = math.tanh %408 : vector<1x32xf32>
    %410 = vector.extract_strided_slice %395 {offsets = [0, 96], sizes = [1, 32], strides = [1, 1]} : vector<1x128xf32> to vector<1x32xf32>
    %411 = arith.negf %410 : vector<1x32xf32>
    %412 = math.exp %411 : vector<1x32xf32>
    %cst_83 = arith.constant 1.000000e+00 : f32
    %413 = vector.broadcast %cst_83 : f32 to vector<1x32xf32>
    %414 = arith.addf %413, %412 : vector<1x32xf32>
    %415 = arith.divf %413, %414 : vector<1x32xf32>
    %416 = arith.mulf %407, %390 : vector<1x32xf32>
    %417 = arith.mulf %401, %409 : vector<1x32xf32>
    %418 = arith.addf %416, %417 : vector<1x32xf32>
    %419 = math.tanh %418 : vector<1x32xf32>
    %420 = arith.mulf %415, %419 : vector<1x32xf32>
    %421 = vector.extract_strided_slice %250 {offsets = [6, 0], sizes = [1, 128], strides = [1, 1]} : vector<8x128xf32> to vector<1x128xf32>
    %cst_84 = arith.constant dense<0.000000e+00> : vector<1x128xf32>
    %422 = tpu.matmul %420, %245, %cst_84 {dimension_numbers = #tpu.dot_dimension_numbers<[1], [0], [0], [1], [0, 0, 1, 1], [], []>} : vector<1x32xf32>, vector<32x128xf32>, vector<1x128xf32> -> vector<1x128xf32>
    %423 = arith.addf %421, %422 : vector<1x128xf32>
    %424 = vector.extract_strided_slice %423 {offsets = [0, 0], sizes = [1, 32], strides = [1, 1]} : vector<1x128xf32> to vector<1x32xf32>
    %425 = arith.negf %424 : vector<1x32xf32>
    %426 = math.exp %425 : vector<1x32xf32>
    %cst_85 = arith.constant 1.000000e+00 : f32
    %427 = vector.broadcast %cst_85 : f32 to vector<1x32xf32>
    %428 = arith.addf %427, %426 : vector<1x32xf32>
    %429 = arith.divf %427, %428 : vector<1x32xf32>
    %430 = vector.extract_strided_slice %423 {offsets = [0, 32], sizes = [1, 32], strides = [1, 1]} : vector<1x128xf32> to vector<1x32xf32>
    %431 = arith.negf %430 : vector<1x32xf32>
    %432 = math.exp %431 : vector<1x32xf32>
    %cst_86 = arith.constant 1.000000e+00 : f32
    %433 = vector.broadcast %cst_86 : f32 to vector<1x32xf32>
    %434 = arith.addf %433, %432 : vector<1x32xf32>
    %435 = arith.divf %433, %434 : vector<1x32xf32>
    %436 = vector.extract_strided_slice %423 {offsets = [0, 64], sizes = [1, 32], strides = [1, 1]} : vector<1x128xf32> to vector<1x32xf32>
    %437 = math.tanh %436 : vector<1x32xf32>
    %438 = vector.extract_strided_slice %423 {offsets = [0, 96], sizes = [1, 32], strides = [1, 1]} : vector<1x128xf32> to vector<1x32xf32>
    %439 = arith.negf %438 : vector<1x32xf32>
    %440 = math.exp %439 : vector<1x32xf32>
    %cst_87 = arith.constant 1.000000e+00 : f32
    %441 = vector.broadcast %cst_87 : f32 to vector<1x32xf32>
    %442 = arith.addf %441, %440 : vector<1x32xf32>
    %443 = arith.divf %441, %442 : vector<1x32xf32>
    %444 = arith.mulf %435, %418 : vector<1x32xf32>
    %445 = arith.mulf %429, %437 : vector<1x32xf32>
    %446 = arith.addf %444, %445 : vector<1x32xf32>
    %447 = math.tanh %446 : vector<1x32xf32>
    %448 = arith.mulf %443, %447 : vector<1x32xf32>
    %449 = vector.extract_strided_slice %250 {offsets = [7, 0], sizes = [1, 128], strides = [1, 1]} : vector<8x128xf32> to vector<1x128xf32>
    %cst_88 = arith.constant dense<0.000000e+00> : vector<1x128xf32>
    %450 = tpu.matmul %448, %245, %cst_88 {dimension_numbers = #tpu.dot_dimension_numbers<[1], [0], [0], [1], [0, 0, 1, 1], [], []>} : vector<1x32xf32>, vector<32x128xf32>, vector<1x128xf32> -> vector<1x128xf32>
    %451 = arith.addf %449, %450 : vector<1x128xf32>
    %452 = vector.extract_strided_slice %451 {offsets = [0, 0], sizes = [1, 32], strides = [1, 1]} : vector<1x128xf32> to vector<1x32xf32>
    %453 = arith.negf %452 : vector<1x32xf32>
    %454 = math.exp %453 : vector<1x32xf32>
    %cst_89 = arith.constant 1.000000e+00 : f32
    %455 = vector.broadcast %cst_89 : f32 to vector<1x32xf32>
    %456 = arith.addf %455, %454 : vector<1x32xf32>
    %457 = arith.divf %455, %456 : vector<1x32xf32>
    %458 = vector.extract_strided_slice %451 {offsets = [0, 32], sizes = [1, 32], strides = [1, 1]} : vector<1x128xf32> to vector<1x32xf32>
    %459 = arith.negf %458 : vector<1x32xf32>
    %460 = math.exp %459 : vector<1x32xf32>
    %cst_90 = arith.constant 1.000000e+00 : f32
    %461 = vector.broadcast %cst_90 : f32 to vector<1x32xf32>
    %462 = arith.addf %461, %460 : vector<1x32xf32>
    %463 = arith.divf %461, %462 : vector<1x32xf32>
    %464 = vector.extract_strided_slice %451 {offsets = [0, 64], sizes = [1, 32], strides = [1, 1]} : vector<1x128xf32> to vector<1x32xf32>
    %465 = math.tanh %464 : vector<1x32xf32>
    %466 = vector.extract_strided_slice %451 {offsets = [0, 96], sizes = [1, 32], strides = [1, 1]} : vector<1x128xf32> to vector<1x32xf32>
    %467 = arith.negf %466 : vector<1x32xf32>
    %468 = math.exp %467 : vector<1x32xf32>
    %cst_91 = arith.constant 1.000000e+00 : f32
    %469 = vector.broadcast %cst_91 : f32 to vector<1x32xf32>
    %470 = arith.addf %469, %468 : vector<1x32xf32>
    %471 = arith.divf %469, %470 : vector<1x32xf32>
    %472 = arith.mulf %463, %446 : vector<1x32xf32>
    %473 = arith.mulf %457, %465 : vector<1x32xf32>
    %474 = arith.addf %472, %473 : vector<1x32xf32>
    %475 = math.tanh %474 : vector<1x32xf32>
    %476 = arith.mulf %471, %475 : vector<1x32xf32>
    %c1_92 = arith.constant 1 : index
    %c0_93 = arith.constant 0 : index
    %c0_94 = arith.constant 0 : index
    %477 = vector.load %arg5[%c1_92, %c0_93, %c0_94] : memref<2x1x32xf32, #tpu.memory_space<vmem>>, vector<1x1x32xf32>
    %478 = vector.shape_cast %477 : vector<1x1x32xf32> to vector<1x32xf32>
    %479 = vector.shape_cast %476 : vector<1x32xf32> to vector<1x1x32xf32>
    tpu.vector_store %arg5[%c1_92, %c0_93, %c0_94], %479 {strides = array<i32>} : memref<2x1x32xf32, #tpu.memory_space<vmem>>, vector<1x1x32xf32>,
    %c1_95 = arith.constant 1 : index
    %c0_96 = arith.constant 0 : index
    %c0_97 = arith.constant 0 : index
    %480 = vector.load %arg6[%c1_95, %c0_96, %c0_97] : memref<2x1x32xf32, #tpu.memory_space<vmem>>, vector<1x1x32xf32>
    %481 = vector.shape_cast %480 : vector<1x1x32xf32> to vector<1x32xf32>
    %482 = vector.shape_cast %474 : vector<1x32xf32> to vector<1x1x32xf32>
    tpu.vector_store %arg6[%c1_95, %c0_96, %c0_97], %482 {strides = array<i32>} : memref<2x1x32xf32, #tpu.memory_space<vmem>>, vector<1x1x32xf32>,
    return
  }
}

</mosaic_0001>

<bundles_post_ra>
// kernel: forward.1
= control target key start
LH: loop header
LB: loop body
LE: loop exit
PB: predicated region body
PF: predicated region fallthrough
CT: control target
= control target key end

     0   :  { %12 = vsyncpa [#allocation3], 0  ;;  %s2990_s0 = inlined_call_operand.vmem [shape: f32[8,4], index: 0, kind: input, shape index: {}]   ;;  %s2991_s1 = inlined_call_operand.vmem [shape: f32[4,128], index: 1, kind: input, shape index: {}]   ;;  %s2992_s2 = inlined_call_operand.hbm [shape: f32[1,32,128], index: 2, kind: input, shape index: {}]   ;;  %s2993_s3 = inlined_call_operand.hbm [shape: f32[2,32,128], index: 3, kind: input, shape index: {}]   ;;  %s2994_s4 = inlined_call_operand.vmem [shape: f32[2,1,128], index: 4, kind: input, shape index: {}]   ;;  %s2995_s5 = inlined_call_operand.hbm [shape: f32[2,1,32], index: 5, kind: output, shape index: {0}]   ;;  %s2996_s6 = inlined_call_operand.hbm [shape: f32[2,1,32], index: 6, kind: output, shape index: {1}]  }
   0x1   :  { %13 = vsyncpa [#allocation6], 0 }
   0x2   :  { %14 = vsyncpa [#allocation4], 0 }
   0x3   :  { %15 = vsyncpa [#allocation9], 0  ;;  %s2650_s21 = smov [#allocation2]   ;;  %s2554_s25 = scalar_lea.hbm %s2992_s2, 512 }
   0x4   :  { %s25_s22 = sshll.u32 %s2650_s21, 4  ;;  %p2555_p0 = scmp.ne.s32.totalorder %s2992_s2, %s2554_s25  ;;  %s26_s22 = int_to_ptr.vmem [resolvable:$true] %s25_s22 }
   0x5   :  { %p2558_p1 = scmp.lt.u32.totalorder %s2554_s25, %s2992_s2 }
   0x7   :  { %p2560_p2 = pnand %p2558_p1, %p2555_p0 }
   0x9   :  { %2563 = shalt.err (!%p2560_p2)
}
   0xa   :  { %s2564_s30 = scalar_lea.vmem %s26_s22, 512  ;;  %p2569_p4 = scmp.lt.s32.totalorder %s26_s22, %s26_s22 }
   0xb   :  { %p2565_p3 = scmp.ne.s32.totalorder %s26_s22, %s2564_s30  ;;  %p2570_p5 = scmp.lt.s32.totalorder %s2564_s30, %s2564_s30 }
   0xd   :  { %p2571_p6 = por %p2570_p5, %p2569_p4 }
   0xf   :  { %p2572_p7 = pnand %p2571_p6, %p2565_p3 }
  0x11   :  { %2575 = shalt.err (!%p2572_p7)
}
  0x12   :  { %s2651_s7 = smov 128   ;;  %s2652_s8 = smov 8  }
  0x13   :  { %31 = dma.hbm_to_vmem [thread:$0]  %s2992_s2, 512, %s26_s22, [#allocation3], %s2651_s7, %s2651_s7, %s2652_s8  }
  0x14   :  { %s2653_s11 = smov [#allocation5]   ;;  %s2576_s15 = scalar_lea.hbm %s2993_s3, 1024 }
  0x15   :  { %s37_s12 = sshll.u32 %s2653_s11, 4  ;;  %p2577_p8 = scmp.ne.s32.totalorder %s2993_s3, %s2576_s15  ;;  %s38_s12 = int_to_ptr.vmem [resolvable:$true] %s37_s12 }
  0x16   :  { %p2580_p9 = scmp.lt.u32.totalorder %s2576_s15, %s2993_s3 }
  0x18   :  { %p2582_p10 = pnand %p2580_p9, %p2577_p8 }
  0x1a   :  { %2585 = shalt.err (!%p2582_p10)
}
  0x1b   :  { %s2586_s20 = scalar_lea.vmem %s38_s12, 1024  ;;  %p2591_p12 = scmp.lt.s32.totalorder %s38_s12, %s38_s12 }
  0x1c   :  { %p2587_p11 = scmp.ne.s32.totalorder %s38_s12, %s2586_s20  ;;  %p2592_p13 = scmp.lt.s32.totalorder %s2586_s20, %s2586_s20 }
  0x1e   :  { %p2593_p0 = por %p2592_p13, %p2591_p12 }
  0x20   :  { %p2594_p1 = pnand %p2593_p0, %p2587_p11 }
  0x22   :  { %2597 = shalt.err (!%p2594_p1)
}
  0x23   :  { %43 = dma.hbm_to_vmem [thread:$0]  %s2993_s3, 1024, %s38_s12, [#allocation6], %s2651_s7, %s2651_s7, %s2652_s8  }
  0x24   :  { %2642 = dma.done.wait [#allocation3], 512  }
  0x25   :  { %2643 = vsyncadd [#allocation3], 4294966784 }
  0x26   :  { %2644 = dma.done.wait [#allocation6], 1024  }
  0x27   :  { %2645 = vsyncadd [#allocation6], 4294966272  ;;  %v2654_v0 = vmov 0.0|0.0   ;;  %v2655_v1 = vmov 0.0   ;;  %vm2656_vm0 = vmmov 0   ;;  %vm69_vm1 = vcmask 1043456  }
  0x28   :  { %2310 = vmatprep.subr.bf16.mxu1 %v2654_v0  ;;  %2118 = vmatprep.subr.mxu0 %v2655_v1  ;;  %vm65_vm2 = vcmask 31744   ;;  %v54_v2 = vld [vmem:[#allocation5] sm:$0xff]  ;;  %v55_v3 = vld [vmem:[#allocation5 + $0x8] sm:$0xff]  ;;  %v56_v7 = vld [vmem:[#allocation5 + $0x10] sm:$0xff]  ;;  %s2657_s25 = smov 64   ;;  %s2658_s26 = smov 32  }
  0x29   :  { %2120 = vmatprep.mubr.msk.f32.mxu0 %vm2656_vm0, %v2655_v1  ;;  %2131 = vmatprep.mubr.msk.f32.mxu1 %vm2656_vm0, %v2655_v1  ;;  %v53_v4 = vld [vmem:[%s2991_s1] sm:$0xf]  ;;  %v2732_v5 = vpack.c.bf16 %v55_v3, %v54_v2  ;;  %v57_v8 = vld [vmem:[#allocation5 + $0x18] sm:$0xff]  ;;  %vm143_vm3 = vcmask 261120   ;;  %vm1001_vm4 = vcmask 1040384   ;;  %vm1003_vm5 = vcmask 1041408  }
  0x2a   :  { %2119 = vmatpush3.msk.msra.mxu0 %vm69_vm1, %v53_v4  ;;  %v52_v6 = vld [vmem:[%s2990_s0] sm:$0xff]  ;;  %v2740_v9 = vpack.c.bf16 %v57_v8, %v56_v7  ;;  %vm1005_vm6 = vcmask 1042432   ;;  %vm1008_vm7 = vcmask 1044480   ;;  %vm1010_vm8 = vcmask 1045504   ;;  %s2660_s29 = smov [#allocation8]  }
  0x2b   :  { %2121 = vmatmul.mubr.msk.f32.vlgmr.msra.gmra.mrb[0].mxu0 %vm65_vm2, %v52_v6  ;;  %2316 = vmatprep.subr.bf16.mxu0 %v2654_v0  ;;  %v1995_v12 = vld [vmem:[%s2994_s4] ss:$0 sm:$0xff]  ;;  %vm1012_vm9 = vcmask 1046528   ;;  %vm994_vm10 = vcmask 261127   ;;  %s1978_s30 = sshll.u32 %s2660_s29, 4  ;;  %s1979_s30 = int_to_ptr.vmem [resolvable:$true] %s1978_s30 }
  0x2c   :  { %2312 = vmatpush3.bf16.msra.mxu1 %v2732_v5  ;;  %2318 = vmatpush3.bf16.msra.mxu0 %v2732_v5  ;;  %s2598_s7 = scalar_lea.vmem %s1979_s30, 32  ;;  %p2603_p3 = scmp.lt.s32.totalorder %s1979_s30, %s1979_s30 }
  0x2d   :  { %2313 = vmatprep.subr.bf16.mxu1 %v2654_v0  ;;  %2319 = vmatprep.subr.bf16.mxu0 %v2654_v0  ;;  %p2599_p2 = scmp.ne.s32.totalorder %s1979_s30, %s2598_s7  ;;  %p2604_p4 = scmp.lt.s32.totalorder %s2598_s7, %s2598_s7 }
  0x2e   :  { %2142 = vmatprep.mubr.msk.f32.mxu0 %vm2656_vm0, %v2655_v1 }
  0x2f   :  { %p2605_p5 = por %p2604_p4, %p2603_p3 }
  0x30   :  { %2315 = vmatpush3.bf16.msra.mxu1 %v2740_v9  ;;  %2321 = vmatpush3.bf16.msra.mxu0 %v2740_v9 }
  0x31   :  { %2322 = vmatprep.subr.bf16.mxu1 %v2654_v0  ;;  %2328 = vmatprep.subr.bf16.mxu0 %v2654_v0  ;;  %p2606_p6 = pnand %p2605_p5, %p2599_p2 }
  0x33   :  { %2132 = vmatmul.mubr.f32.vlgmr.msra.gmra.mrb[0].mxu1 %v2655_v1 }
  0x34   :  { %2324 = vmatpush3.bf16.msra.mxu1 %v2732_v5  ;;  %2153 = vmatprep.mubr.msk.f32.mxu1 %vm2656_vm0, %v2655_v1 }
  0x35   :  { %2325 = vmatprep.subr.bf16.mxu1 %v2654_v0 }
  0x38   :  { %2327 = vmatpush3.bf16.msra.mxu1 %v2740_v9 }
  0x39   :  { %2334 = vmatprep.subr.bf16.mxu1 %v2654_v0 }
  0xfe   :  { %v139_v10 = vpop.f32.mrb[0].mxu0 }
  0xff   :  { %v2122_v11 = vpop.f32.mrb[1].mxu0  ;;  %v2761_v13 = vadd.f32 %v1995_v12, %v139_v10 }
 0x106   :  { %v213_v14 = vpop.f32.mrb[0].mxu1 }
 0x107   :  { %v217_v15 = vadd.f32 %v213_v14, %v2761_v13  ;;  %v2133_v16 = vpop.f32.mrb[1].mxu1 }
 0x109   :  { %2426 = vtanh.f32 %v217_v15  ;;  %v1998_v18 = vmul.f32 -1.442695, %v217_v15 }
 0x10b   :  { %2428 = vpow2.f32 %v1998_v18 }
 0x113   :  { %v2427_v17 = vpop.eup %2426 }
 0x114   :  { %227 = vrot.lane.b32.xlu0 %v2427_v17, %s2657_s25 }
 0x115   :  { %v2429_v19 = vpop.eup %2428 }
 0x116   :  { %v221_v20 = vadd.f32 1.0, %v2429_v19 }
 0x118   :  { %2430 = vrcp.f32 %v221_v20 }
 0x122   :  { %v2431_v21 = vpop.eup %2430 }
 0x123   :  { %v225_v24 = vmul.f32 0.0, %v2431_v21 }
 0x186   :  { %v228_v22 = vpop.permute.xlu0 %227 }
 0x187   :  { %v230_v23 = vmul.f32 %v2431_v21, %v228_v22 }
 0x189   :  { %232 = vrot.lane.b32.xlu0 %v230_v23, %s2658_s26 }
 0x1fb   :  { %v233_v25 = vpop.permute.xlu0 %232 }
 0x1fc   :  { %v235_v26 = vadd.f32 %v233_v25, %v225_v24 }
 0x1fe   :  { %2432 = vtanh.f32 %v235_v26  ;;  %v329_v42 = vrot.slane %v235_v26, 7 }
 0x208   :  { %v2433_v27 = vpop.eup %2432 }
 0x209   :  { %238 = vrot.lane.b32.xlu1 %v2433_v27, %s2657_s25 }
 0x27b   :  { %v239_v28 = vpop.permute.xlu1 %238 }
 0x27c   :  { %v2767_v29 = vmul.f32 %v2431_v21, %v239_v28 }
 0x27e   :  { %243 = vrot.lane.b32.xlu1 %v2767_v29, %s2658_s26 }
 0x2f0   :  { %v244_v30 = vpop.permute.xlu1 %243 }
 0x2f1   :  { %2143 = vmatmul.mubr.msk.f32.vlgmr.msra.gmra.mrb[2].mxu0 %vm143_vm3, %v244_v30 }
 0x2f2   :  { %2330 = vmatpush3.bf16.msra.mxu0 %v2732_v5  ;;  %2164 = vmatprep.mubr.msk.f32.mxu0 %vm2656_vm0, %v2655_v1 }
 0x2f3   :  { %2331 = vmatprep.subr.bf16.mxu0 %v2654_v0 }
 0x2f6   :  { %2333 = vmatpush3.bf16.msra.mxu0 %v2740_v9 }
 0x2f7   :  { %2340 = vmatprep.subr.bf16.mxu0 %v2654_v0 }
 0x3c4   :  { %v313_v31 = vpop.f32.mrb[2].mxu0 }
 0x3c5   :  { %v318_v32 = vrot.slane %v313_v31, 7  ;;  %v2144_v33 = vpop.f32.mrb[3].mxu0 }
 0x3c7   :  { %v320_v34 = vadd.f32 %v318_v32, %v2761_v13 }
 0x3c9   :  { %2434 = vtanh.f32 %v320_v34  ;;  %v2000_v36 = vmul.f32 -1.442695, %v320_v34 }
 0x3cb   :  { %2436 = vpow2.f32 %v2000_v36 }
 0x3d3   :  { %v2435_v35 = vpop.eup %2434 }
 0x3d4   :  { %333 = vrot.lane.b32.xlu0 %v2435_v35, %s2657_s25 }
 0x3d5   :  { %v2437_v37 = vpop.eup %2436 }
 0x3d6   :  { %v324_v38 = vadd.f32 1.0, %v2437_v37 }
 0x3d8   :  { %2438 = vrcp.f32 %v324_v38 }
 0x3e2   :  { %v2439_v39 = vpop.eup %2438 }
 0x3e3   :  { %v331_v43 = vmul.f32 %v2439_v39, %v329_v42 }
 0x446   :  { %v334_v40 = vpop.permute.xlu0 %333 }
 0x447   :  { %v336_v41 = vmul.f32 %v2439_v39, %v334_v40 }
 0x449   :  { %338 = vrot.lane.b32.xlu1 %v336_v41, %s2658_s26 }
 0x4bb   :  { %v339_v44 = vpop.permute.xlu1 %338 }
 0x4bc   :  { %v341_v45 = vadd.f32 %v339_v44, %v331_v43 }
 0x4be   :  { %2440 = vtanh.f32 %v341_v45  ;;  %v436_v62 = vrot.slane %v341_v45, 7 }
 0x4c8   :  { %v2441_v46 = vpop.eup %2440 }
 0x4c9   :  { %344 = vrot.lane.b32.xlu0 %v2441_v46, %s2657_s25 }
 0x53b   :  { %v345_v47 = vpop.permute.xlu0 %344 }
 0x53c   :  { %v347_v48 = vmul.f32 %v2439_v39, %v345_v47 }
 0x53e   :  { %v349_v49 = vrot.slane %v347_v48, 1  ;;  %v1002_v8 = vsel %vm1001_vm4, %v2767_v29, %v347_v48 }
 0x540   :  { %350 = vrot.lane.b32.xlu1 %v349_v49, %s2658_s26 }
 0x5b2   :  { %v351_v50 = vpop.permute.xlu1 %350 }
 0x5b3   :  { %2154 = vmatmul.mubr.msk.f32.vlgmr.msra.gmra.mrb[2].mxu1 %vm143_vm3, %v351_v50 }
 0x5b4   :  { %2336 = vmatpush3.bf16.msra.mxu1 %v2732_v5  ;;  %2175 = vmatprep.mubr.msk.f32.mxu1 %vm2656_vm0, %v2655_v1 }
 0x5b5   :  { %2337 = vmatprep.subr.bf16.mxu1 %v2654_v0 }
 0x5b8   :  { %2339 = vmatpush3.bf16.msra.mxu1 %v2740_v9 }
 0x5b9   :  { %2346 = vmatprep.subr.bf16.mxu1 %v2654_v0 }
 0x686   :  { %v420_v51 = vpop.f32.mrb[2].mxu1 }
 0x687   :  { %v425_v52 = vrot.slane %v420_v51, 6  ;;  %v2155_v53 = vpop.f32.mrb[3].mxu1 }
 0x689   :  { %v427_v54 = vadd.f32 %v425_v52, %v2761_v13 }
 0x68b   :  { %2442 = vtanh.f32 %v427_v54  ;;  %v2002_v56 = vmul.f32 -1.442695, %v427_v54 }
 0x68d   :  { %2444 = vpow2.f32 %v2002_v56 }
 0x695   :  { %v2443_v55 = vpop.eup %2442 }
 0x696   :  { %440 = vrot.lane.b32.xlu0 %v2443_v55, %s2657_s25 }
 0x697   :  { %v2445_v57 = vpop.eup %2444 }
 0x698   :  { %v431_v58 = vadd.f32 1.0, %v2445_v57 }
 0x69a   :  { %2446 = vrcp.f32 %v431_v58 }
 0x6a4   :  { %v2447_v59 = vpop.eup %2446 }
 0x6a5   :  { %v438_v63 = vmul.f32 %v2447_v59, %v436_v62 }
 0x708   :  { %v441_v60 = vpop.permute.xlu0 %440 }
 0x709   :  { %v443_v61 = vmul.f32 %v2447_v59, %v441_v60 }
 0x70b   :  { %445 = vrot.lane.b32.xlu1 %v443_v61, %s2658_s26 }
 0x77d   :  { %v446_v2 = vpop.permute.xlu1 %445 }
 0x77e   :  { %v448_v3 = vadd.f32 %v446_v2, %v438_v63 }
 0x780   :  { %2448 = vtanh.f32 %v448_v3  ;;  %v543_v25 = vrot.slane %v448_v3, 7 }
 0x78a   :  { %v2449_v4 = vpop.eup %2448 }
 0x78b   :  { %451 = vrot.lane.b32.xlu0 %v2449_v4, %s2657_s25 }
 0x7fd   :  { %v452_v6 = vpop.permute.xlu0 %451 }
 0x7fe   :  { %v454_v7 = vmul.f32 %v2447_v59, %v452_v6 }
 0x800   :  { %v456_v10 = vrot.slane %v454_v7, 2  ;;  %v1004_v11 = vsel %vm1003_vm5, %v1002_v8, %v454_v7 }
 0x802   :  { %457 = vrot.lane.b32.xlu1 %v456_v10, %s2658_s26 }
 0x874   :  { %v458_v12 = vpop.permute.xlu1 %457 }
 0x875   :  { %2165 = vmatmul.mubr.msk.f32.vlgmr.msra.gmra.mrb[4].mxu0 %vm143_vm3, %v458_v12 }
 0x876   :  { %2342 = vmatpush3.bf16.msra.mxu0 %v2732_v5  ;;  %2186 = vmatprep.mubr.msk.f32.mxu0 %vm2656_vm0, %v2655_v1 }
 0x877   :  { %2343 = vmatprep.subr.bf16.mxu0 %v2654_v0 }
 0x87a   :  { %2345 = vmatpush3.bf16.msra.mxu0 %v2740_v9 }
 0x87b   :  { %2352 = vmatprep.subr.bf16.mxu0 %v2654_v0 }
 0x948   :  { %v527_v14 = vpop.f32.mrb[4].mxu0 }
 0x949   :  { %v532_v15 = vrot.slane %v527_v14, 5  ;;  %v2166_v16 = vpop.f32.mrb[5].mxu0 }
 0x94b   :  { %v534_v17 = vadd.f32 %v532_v15, %v2761_v13 }
 0x94d   :  { %2450 = vtanh.f32 %v534_v17  ;;  %v2004_v19 = vmul.f32 -1.442695, %v534_v17 }
 0x94f   :  { %2452 = vpow2.f32 %v2004_v19 }
 0x957   :  { %v2451_v18 = vpop.eup %2450 }
 0x958   :  { %547 = vrot.lane.b32.xlu0 %v2451_v18, %s2657_s25 }
 0x959   :  { %v2453_v20 = vpop.eup %2452 }
 0x95a   :  { %v538_v21 = vadd.f32 1.0, %v2453_v20 }
 0x95c   :  { %2454 = vrcp.f32 %v538_v21 }
 0x966   :  { %v2455_v22 = vpop.eup %2454 }
 0x967   :  { %v545_v26 = vmul.f32 %v2455_v22, %v543_v25 }
 0x9ca   :  { %v548_v23 = vpop.permute.xlu0 %547 }
 0x9cb   :  { %v550_v24 = vmul.f32 %v2455_v22, %v548_v23 }
 0x9cd   :  { %552 = vrot.lane.b32.xlu1 %v550_v24, %s2658_s26 }
 0xa3f   :  { %v553_v27 = vpop.permute.xlu1 %552 }
 0xa40   :  { %v555_v28 = vadd.f32 %v553_v27, %v545_v26 }
 0xa42   :  { %2456 = vtanh.f32 %v555_v28  ;;  %v650_v46 = vrot.slane %v555_v28, 7 }
 0xa4c   :  { %v2457_v29 = vpop.eup %2456 }
 0xa4d   :  { %558 = vrot.lane.b32.xlu0 %v2457_v29, %s2657_s25 }
 0xabf   :  { %v559_v30 = vpop.permute.xlu0 %558 }
 0xac0   :  { %v561_v31 = vmul.f32 %v2455_v22, %v559_v30 }
 0xac2   :  { %v563_v32 = vrot.slane %v561_v31, 3  ;;  %v1006_v33 = vsel %vm1005_vm6, %v1004_v11, %v561_v31 }
 0xac4   :  { %564 = vrot.lane.b32.xlu1 %v563_v32, %s2658_s26 }
 0xb36   :  { %v565_v34 = vpop.permute.xlu1 %564 }
 0xb37   :  { %2176 = vmatmul.mubr.msk.f32.vlgmr.msra.gmra.mrb[4].mxu1 %vm143_vm3, %v565_v34 }
 0xb38   :  { %2348 = vmatpush3.bf16.msra.mxu1 %v2732_v5  ;;  %2197 = vmatprep.mubr.msk.f32.mxu1 %vm2656_vm0, %v2655_v1 }
 0xb39   :  { %2349 = vmatprep.subr.bf16.mxu1 %v2654_v0 }
 0xb3c   :  { %2351 = vmatpush3.bf16.msra.mxu1 %v2740_v9 }
 0xb3d   :  { %2358 = vmatprep.subr.bf16.mxu1 %v2654_v0 }
 0xc0a   :  { %v634_v35 = vpop.f32.mrb[4].mxu1 }
 0xc0b   :  { %v639_v36 = vrot.slane %v634_v35, 4  ;;  %v2177_v37 = vpop.f32.mrb[5].mxu1 }
 0xc0d   :  { %v641_v38 = vadd.f32 %v639_v36, %v2761_v13 }
 0xc0f   :  { %2458 = vtanh.f32 %v641_v38  ;;  %v2006_v40 = vmul.f32 -1.442695, %v641_v38 }
 0xc11   :  { %2460 = vpow2.f32 %v2006_v40 }
 0xc19   :  { %v2459_v39 = vpop.eup %2458 }
 0xc1a   :  { %654 = vrot.lane.b32.xlu0 %v2459_v39, %s2657_s25 }
 0xc1b   :  { %v2461_v41 = vpop.eup %2460 }
 0xc1c   :  { %v645_v42 = vadd.f32 1.0, %v2461_v41 }
 0xc1e   :  { %2462 = vrcp.f32 %v645_v42 }
 0xc28   :  { %v2463_v43 = vpop.eup %2462 }
 0xc29   :  { %v652_v47 = vmul.f32 %v2463_v43, %v650_v46 }
 0xc8c   :  { %v655_v44 = vpop.permute.xlu0 %654 }
 0xc8d   :  { %v657_v45 = vmul.f32 %v2463_v43, %v655_v44 }
 0xc8f   :  { %659 = vrot.lane.b32.xlu1 %v657_v45, %s2658_s26 }
 0xd01   :  { %v660_v48 = vpop.permute.xlu1 %659 }
 0xd02   :  { %v662_v49 = vadd.f32 %v660_v48, %v652_v47 }
 0xd04   :  { %2464 = vtanh.f32 %v662_v49 }
 0xd0e   :  { %v2465_v50 = vpop.eup %2464 }
 0xd0f   :  { %665 = vrot.lane.b32.xlu0 %v2465_v50, %s2657_s25 }
 0xd81   :  { %v666_v51 = vpop.permute.xlu0 %665 }
 0xd82   :  { %v668_v52 = vmul.f32 %v2463_v43, %v666_v51 }
 0xd84   :  { %v670_v53 = vrot.slane %v668_v52, 4  ;;  %v1007_v54 = vsel %vm69_vm1, %v1006_v33, %v668_v52  ;;  %v1015_v52 = vld [vmem:[#allocation2 + $0x8] sm:$0xff] }
 0xd86   :  { %671 = vrot.lane.b32.xlu1 %v670_v53, %s2658_s26  ;;  %v1019_v53 = vld [vmem:[#allocation5 + $0x20] sm:$0xff] }
 0xdf8   :  { %v672_v55 = vpop.permute.xlu1 %671 }
 0xdf9   :  { %2187 = vmatmul.mubr.msk.f32.vlgmr.msra.gmra.mrb[6].mxu0 %vm143_vm3, %v672_v55  ;;  %v1020_v55 = vld [vmem:[#allocation5 + $0x28] sm:$0xff] }
 0xdfa   :  { %2354 = vmatpush3.bf16.msra.mxu0 %v2732_v5  ;;  %2208 = vmatprep.mubr.msk.f32.mxu0 %vm2656_vm0, %v2655_v1 }
 0xdfb   :  { %2355 = vmatprep.subr.bf16.mxu0 %v2654_v0 }
 0xdfe   :  { %2357 = vmatpush3.bf16.msra.mxu0 %v2740_v9  ;;  %v757_v9 = vrot.slane %v662_v49, 7 }
 0xdff   :  { %2364 = vmatprep.subr.bf16.mxu0 %v2654_v0 }
 0xecc   :  { %v741_v56 = vpop.f32.mrb[6].mxu0 }
 0xecd   :  { %v746_v57 = vrot.slane %v741_v56, 3  ;;  %v2188_v58 = vpop.f32.mrb[7].mxu0  ;;  %v1016_v56 = vld [vmem:[#allocation2 + $0x10] sm:$0xff] }
 0xece   :  { %v2850_v58 = vpack.c.bf16 %v1020_v55, %v1019_v53 }
 0xecf   :  { %v748_v59 = vadd.f32 %v746_v57, %v2761_v13  ;;  %v1017_v57 = vld [vmem:[#allocation2 + $0x18] sm:$0xff] }
 0xed1   :  { %2466 = vtanh.f32 %v748_v59  ;;  %v2008_v61 = vmul.f32 -1.442695, %v748_v59  ;;  %v1021_v59 = vld [vmem:[#allocation5 + $0x30] sm:$0xff] }
 0xed3   :  { %2468 = vpow2.f32 %v2008_v61  ;;  %v2362_v61 = vpack.c.bf16 %v1017_v57, %v1016_v56 }
 0xedb   :  { %v2467_v60 = vpop.eup %2466 }
 0xedc   :  { %761 = vrot.lane.b32.xlu0 %v2467_v60, %s2657_s25  ;;  %v1022_v60 = vld [vmem:[#allocation5 + $0x38] sm:$0xff] }
 0xedd   :  { %v2469_v5 = vpop.eup %2468 }
 0xede   :  { %v752_v62 = vadd.f32 1.0, %v2469_v5  ;;  %v2854_v5 = vpack.c.bf16 %v1022_v60, %v1021_v59 }
 0xee0   :  { %2470 = vrcp.f32 %v752_v62 }
 0xeea   :  { %v2471_v63 = vpop.eup %2470 }
 0xeeb   :  { %v759_v4 = vmul.f32 %v2471_v63, %v757_v9 }
 0xf4e   :  { %v762_v2 = vpop.permute.xlu0 %761 }
 0xf4f   :  { %v764_v3 = vmul.f32 %v2471_v63, %v762_v2 }
 0xf51   :  { %766 = vrot.lane.b32.xlu1 %v764_v3, %s2658_s26 }
 0xfc3   :  { %v767_v6 = vpop.permute.xlu1 %766 }
 0xfc4   :  { %v769_v7 = vadd.f32 %v767_v6, %v759_v4 }
 0xfc6   :  { %2472 = vtanh.f32 %v769_v7  ;;  %v864_v27 = vrot.slane %v769_v7, 7  ;;  %v2014_v7 = vld [vmem:[%s2994_s4 + $0x1] ss:$0 sm:$0xff]  ;;  %s2659_s4 = smov 96  }
 0xfd0   :  { %v2473_v8 = vpop.eup %2472 }
 0xfd1   :  { %772 = vrot.lane.b32.xlu0 %v2473_v8, %s2657_s25 }
0x1043   :  { %v773_v10 = vpop.permute.xlu0 %772 }
0x1044   :  { %v775_v11 = vmul.f32 %v2471_v63, %v773_v10 }
0x1046   :  { %v777_v12 = vrot.slane %v775_v11, 5  ;;  %v1009_v14 = vsel %vm1008_vm7, %v1007_v54, %v775_v11 }
0x1048   :  { %778 = vrot.lane.b32.xlu1 %v777_v12, %s2658_s26 }
0x10ba   :  { %v779_v15 = vpop.permute.xlu1 %778 }
0x10bb   :  { %2198 = vmatmul.mubr.msk.f32.vlgmr.msra.gmra.mrb[6].mxu1 %vm143_vm3, %v779_v15 }
0x10bc   :  { %2219 = vmatprep.mubr.msk.f32.mxu1 %vm2656_vm0, %v2655_v1 }
0x118e   :  { %v848_v16 = vpop.f32.mrb[6].mxu1 }
0x118f   :  { %v853_v17 = vrot.slane %v848_v16, 2  ;;  %v2199_v18 = vpop.f32.mrb[7].mxu1 }
0x1191   :  { %v855_v19 = vadd.f32 %v853_v17, %v2761_v13 }
0x1193   :  { %2474 = vtanh.f32 %v855_v19  ;;  %v2010_v21 = vmul.f32 -1.442695, %v855_v19 }
0x1195   :  { %2476 = vpow2.f32 %v2010_v21 }
0x119d   :  { %v2475_v20 = vpop.eup %2474 }
0x119e   :  { %868 = vrot.lane.b32.xlu0 %v2475_v20, %s2657_s25 }
0x119f   :  { %v2477_v22 = vpop.eup %2476 }
0x11a0   :  { %v859_v23 = vadd.f32 1.0, %v2477_v22 }
0x11a2   :  { %2478 = vrcp.f32 %v859_v23 }
0x11ac   :  { %v2479_v24 = vpop.eup %2478 }
0x11ad   :  { %v866_v28 = vmul.f32 %v2479_v24, %v864_v27 }
0x1210   :  { %v869_v25 = vpop.permute.xlu0 %868 }
0x1211   :  { %v871_v26 = vmul.f32 %v2479_v24, %v869_v25 }
0x1213   :  { %873 = vrot.lane.b32.xlu1 %v871_v26, %s2658_s26 }
0x1285   :  { %v874_v29 = vpop.permute.xlu1 %873 }
0x1286   :  { %v876_v30 = vadd.f32 %v874_v29, %v866_v28 }
0x1288   :  { %2480 = vtanh.f32 %v876_v30  ;;  %v971_v48 = vrot.slane %v876_v30, 7 }
0x1292   :  { %v2481_v31 = vpop.eup %2480 }
0x1293   :  { %879 = vrot.lane.b32.xlu0 %v2481_v31, %s2657_s25 }
0x1305   :  { %v880_v32 = vpop.permute.xlu0 %879 }
0x1306   :  { %v882_v33 = vmul.f32 %v2479_v24, %v880_v32 }
0x1308   :  { %v884_v34 = vrot.slane %v882_v33, 6  ;;  %v1011_v35 = vsel %vm1010_vm8, %v1009_v14, %v882_v33 }
0x130a   :  { %885 = vrot.lane.b32.xlu1 %v884_v34, %s2658_s26 }
0x137c   :  { %v886_v36 = vpop.permute.xlu1 %885 }
0x137d   :  { %2209 = vmatmul.mubr.msk.f32.vlgmr.msra.gmra.mrb[8].mxu0 %vm143_vm3, %v886_v36 }
0x137e   :  { %2230 = vmatprep.mubr.msk.f32.mxu0 %vm2656_vm0, %v2655_v1  ;;  %2366 = vmatpush3.bf16.msra.mxu0 %v2850_v58 }
0x137f   :  { %2367 = vmatprep.subr.bf16.mxu0 %v2654_v0 }
0x1382   :  { %2369 = vmatpush3.bf16.msra.mxu0 %v2854_v5 }
0x1383   :  { %2376 = vmatprep.subr.bf16.mxu0 %v2654_v0 }
0x1385   :  { %2231 = vmatmul.mubr.f32.vlgmr.msra.gmra.mrb[10].mxu0 %v2655_v1 }
0x1386   :  { %2378 = vmatpush3.bf16.msra.mxu0 %v2850_v58  ;;  %2252 = vmatprep.mubr.msk.f32.mxu0 %vm2656_vm0, %v2655_v1 }
0x1387   :  { %2379 = vmatprep.subr.bf16.mxu0 %v2654_v0 }
0x138a   :  { %2381 = vmatpush3.bf16.msra.mxu0 %v2854_v5 }
0x138b   :  { %2388 = vmatprep.subr.bf16.mxu0 %v2654_v0 }
0x1450   :  { %v955_v37 = vpop.f32.mrb[8].mxu0 }
0x1451   :  { %v960_v38 = vrot.slane %v955_v37, 1  ;;  %v2210_v39 = vpop.f32.mrb[9].mxu0 }
0x1453   :  { %v962_v40 = vadd.f32 %v960_v38, %v2761_v13  ;;  %v1014_v13 = vld [vmem:[#allocation2] sm:$0xff] }
0x1454   :  { %v2359_v54 = vpack.c.bf16 %v1015_v52, %v1014_v13 }
0x1455   :  { %2482 = vtanh.f32 %v962_v40  ;;  %v2012_v42 = vmul.f32 -1.442695, %v962_v40 }
0x1456   :  { %2360 = vmatpush3.bf16.msra.mxu1 %v2359_v54 }
0x1457   :  { %2484 = vpow2.f32 %v2012_v42  ;;  %2361 = vmatprep.subr.bf16.mxu1 %v2654_v0 }
0x1458   :  { %v1172_v4 = vpop.f32.mrb[10].mxu0 }
0x1459   :  { %v2232_v6 = vpop.f32.mrb[11].mxu0 }
0x145a   :  { %2363 = vmatpush3.bf16.msra.mxu1 %v2362_v61 }
0x145b   :  { %2370 = vmatprep.subr.bf16.mxu1 %v2654_v0 }
0x145f   :  { %v2483_v41 = vpop.eup %2482 }
0x1460   :  { %975 = vrot.lane.b32.xlu0 %v2483_v41, %s2657_s25 }
0x1461   :  { %v2485_v43 = vpop.eup %2484 }
0x1462   :  { %v966_v44 = vadd.f32 1.0, %v2485_v43 }
0x1464   :  { %2486 = vrcp.f32 %v966_v44 }
0x146e   :  { %v2487_v45 = vpop.eup %2486 }
0x146f   :  { %v973_v49 = vmul.f32 %v2487_v45, %v971_v48 }
0x14d2   :  { %v976_v46 = vpop.permute.xlu0 %975 }
0x14d3   :  { %v978_v47 = vmul.f32 %v2487_v45, %v976_v46 }
0x14d5   :  { %980 = vrot.lane.b32.xlu1 %v978_v47, %s2658_s26 }
0x1547   :  { %v981_v50 = vpop.permute.xlu1 %980 }
0x1548   :  { %v2847_v51 = vadd.f32 %v981_v50, %v973_v49 }
0x154a   :  { %2488 = vtanh.f32 %v2847_v51 }
0x1554   :  { %v2489_v62 = vpop.eup %2488 }
0x1555   :  { %986 = vrot.lane.b32.xlu0 %v2489_v62, %s2657_s25 }
0x15c7   :  { %v987_v63 = vpop.permute.xlu0 %986 }
0x15c8   :  { %v2868_v2 = vmul.f32 %v2487_v45, %v987_v63 }
0x15ca   :  { %v1013_v3 = vsel %vm1012_vm9, %v1011_v35, %v2868_v2 }
0x15cb   :  { %1032 = vrot.lane.b32.xlu1 %v1013_v3, %s2658_s26 }
0x163d   :  { %v1033_v9 = vpop.permute.xlu1 %1032 }
0x163e   :  { %2220 = vmatmul.mubr.msk.f32.vlgmr.msra.gmra.mrb[8].mxu1 %vm143_vm3, %v1033_v9 }
0x163f   :  { %2372 = vmatpush3.bf16.msra.mxu1 %v2850_v58  ;;  %2241 = vmatprep.mubr.msk.f32.mxu1 %vm2656_vm0, %v2655_v1 }
0x1640   :  { %2373 = vmatprep.subr.bf16.mxu1 %v2654_v0 }
0x1643   :  { %2375 = vmatpush3.bf16.msra.mxu1 %v2854_v5 }
0x1644   :  { %2382 = vmatprep.subr.bf16.mxu1 %v2654_v0 }
0x1711   :  { %v1102_v8 = vpop.f32.mrb[8].mxu1 }
0x1712   :  { %v2882_v10 = vadd.f32 %v2014_v7, %v1102_v8  ;;  %v2221_v11 = vpop.f32.mrb[9].mxu1 }
0x1714   :  { %v1176_v12 = vadd.f32 %v1172_v4, %v2882_v10 }
0x1716   :  { %2490 = vtanh.f32 %v1176_v12  ;;  %v2016_v15 = vmul.f32 -1.442695, %v1176_v12 }
0x1718   :  { %2492 = vpow2.f32 %v2016_v15 }
0x1720   :  { %v2491_v14 = vpop.eup %2490 }
0x1721   :  { %1186 = vrot.lane.b32.xlu0 %v2491_v14, %s2657_s25 }
0x1722   :  { %v2493_v16 = vpop.eup %2492 }
0x1723   :  { %v1180_v17 = vadd.f32 1.0, %v2493_v16 }
0x1725   :  { %2494 = vrcp.f32 %v1180_v17 }
0x172f   :  { %v2495_v18 = vpop.eup %2494 }
0x1730   :  { %v1184_v21 = vmul.f32 0.0, %v2495_v18 }
0x1793   :  { %v1187_v19 = vpop.permute.xlu0 %1186 }
0x1794   :  { %v1189_v20 = vmul.f32 %v2495_v18, %v1187_v19 }
0x1796   :  { %1191 = vrot.lane.b32.xlu1 %v1189_v20, %s2658_s26 }
0x1808   :  { %v1192_v22 = vpop.permute.xlu1 %1191 }
0x1809   :  { %v1194_v23 = vadd.f32 %v1192_v22, %v1184_v21 }
0x180b   :  { %2496 = vtanh.f32 %v1194_v23  ;;  %v1288_v39 = vrot.slane %v1194_v23, 7 }
0x1815   :  { %v2497_v24 = vpop.eup %2496 }
0x1816   :  { %1197 = vrot.lane.b32.xlu0 %v2497_v24, %s2657_s25 }
0x1888   :  { %v1198_v25 = vpop.permute.xlu0 %1197 }
0x1889   :  { %v1200_v26 = vmul.f32 %v2495_v18, %v1198_v25 }
0x188b   :  { %1202 = vrot.lane.b32.xlu1 %v1200_v26, %s2658_s26 }
0x18fd   :  { %v1203_v27 = vpop.permute.xlu1 %1202 }
0x18fe   :  { %2242 = vmatmul.mubr.msk.f32.vlgmr.msra.gmra.mrb[10].mxu1 %vm143_vm3, %v1203_v27 }
0x18ff   :  { %2384 = vmatpush3.bf16.msra.mxu1 %v2850_v58  ;;  %2263 = vmatprep.mubr.msk.f32.mxu1 %vm2656_vm0, %v2655_v1 }
0x1900   :  { %2385 = vmatprep.subr.bf16.mxu1 %v2654_v0 }
0x1903   :  { %2387 = vmatpush3.bf16.msra.mxu1 %v2854_v5 }
0x1904   :  { %2394 = vmatprep.subr.bf16.mxu1 %v2654_v0 }
0x19d1   :  { %v1272_v28 = vpop.f32.mrb[10].mxu1 }
0x19d2   :  { %v1277_v29 = vrot.slane %v1272_v28, 7  ;;  %v2243_v30 = vpop.f32.mrb[11].mxu1 }
0x19d4   :  { %v1279_v31 = vadd.f32 %v1277_v29, %v2882_v10 }
0x19d6   :  { %2498 = vtanh.f32 %v1279_v31  ;;  %v2018_v33 = vmul.f32 -1.442695, %v1279_v31 }
0x19d8   :  { %2500 = vpow2.f32 %v2018_v33 }
0x19e0   :  { %v2499_v32 = vpop.eup %2498 }
0x19e1   :  { %1292 = vrot.lane.b32.xlu0 %v2499_v32, %s2657_s25 }
0x19e2   :  { %v2501_v34 = vpop.eup %2500 }
0x19e3   :  { %v1283_v35 = vadd.f32 1.0, %v2501_v34 }
0x19e5   :  { %2502 = vrcp.f32 %v1283_v35 }
0x19ef   :  { %v2503_v36 = vpop.eup %2502 }
0x19f0   :  { %v1290_v40 = vmul.f32 %v2503_v36, %v1288_v39 }
0x1a53   :  { %v1293_v37 = vpop.permute.xlu0 %1292 }
0x1a54   :  { %v1295_v38 = vmul.f32 %v2503_v36, %v1293_v37 }
0x1a56   :  { %1297 = vrot.lane.b32.xlu1 %v1295_v38, %s2658_s26 }
0x1ac8   :  { %v1298_v41 = vpop.permute.xlu1 %1297 }
0x1ac9   :  { %v1300_v42 = vadd.f32 %v1298_v41, %v1290_v40 }
0x1acb   :  { %2504 = vtanh.f32 %v1300_v42  ;;  %v1395_v60 = vrot.slane %v1300_v42, 7 }
0x1ad5   :  { %v2505_v43 = vpop.eup %2504 }
0x1ad6   :  { %1303 = vrot.lane.b32.xlu0 %v2505_v43, %s2657_s25 }
0x1b48   :  { %v1304_v44 = vpop.permute.xlu0 %1303 }
0x1b49   :  { %v1306_v45 = vmul.f32 %v2503_v36, %v1304_v44 }
0x1b4b   :  { %v1308_v46 = vrot.slane %v1306_v45, 1 }
0x1b4d   :  { %1309 = vrot.lane.b32.xlu1 %v1308_v46, %s2658_s26 }
0x1bbf   :  { %v1310_v47 = vpop.permute.xlu1 %1309 }
0x1bc0   :  { %2253 = vmatmul.mubr.msk.f32.vlgmr.msra.gmra.mrb[12].mxu0 %vm143_vm3, %v1310_v47 }
0x1bc1   :  { %2390 = vmatpush3.bf16.msra.mxu0 %v2850_v58  ;;  %2274 = vmatprep.mubr.msk.f32.mxu0 %vm2656_vm0, %v2655_v1 }
0x1bc2   :  { %2391 = vmatprep.subr.bf16.mxu0 %v2654_v0 }
0x1bc5   :  { %2393 = vmatpush3.bf16.msra.mxu0 %v2854_v5 }
0x1bc6   :  { %2400 = vmatprep.subr.bf16.mxu0 %v2654_v0 }
0x1c93   :  { %v1379_v48 = vpop.f32.mrb[12].mxu0 }
0x1c94   :  { %v1384_v49 = vrot.slane %v1379_v48, 6  ;;  %v2254_v50 = vpop.f32.mrb[13].mxu0 }
0x1c96   :  { %v1386_v13 = vadd.f32 %v1384_v49, %v2882_v10 }
0x1c98   :  { %2506 = vtanh.f32 %v1386_v13  ;;  %v2020_v53 = vmul.f32 -1.442695, %v1386_v13 }
0x1c9a   :  { %2508 = vpow2.f32 %v2020_v53 }
0x1ca2   :  { %v2507_v52 = vpop.eup %2506 }
0x1ca3   :  { %1399 = vrot.lane.b32.xlu0 %v2507_v52, %s2657_s25 }
0x1ca4   :  { %v2509_v54 = vpop.eup %2508 }
0x1ca5   :  { %v1390_v55 = vadd.f32 1.0, %v2509_v54 }
0x1ca7   :  { %2510 = vrcp.f32 %v1390_v55 }
0x1cb1   :  { %v2511_v56 = vpop.eup %2510 }
0x1cb2   :  { %v1397_v61 = vmul.f32 %v2511_v56, %v1395_v60 }
0x1d15   :  { %v1400_v57 = vpop.permute.xlu0 %1399 }
0x1d16   :  { %v1402_v59 = vmul.f32 %v2511_v56, %v1400_v57 }
0x1d18   :  { %1404 = vrot.lane.b32.xlu1 %v1402_v59, %s2658_s26 }
0x1d8a   :  { %v1405_v62 = vpop.permute.xlu1 %1404 }
0x1d8b   :  { %v1407_v63 = vadd.f32 %v1405_v62, %v1397_v61 }
0x1d8d   :  { %2512 = vtanh.f32 %v1407_v63  ;;  %v1502_v22 = vrot.slane %v1407_v63, 7 }
0x1d97   :  { %v2513_v3 = vpop.eup %2512 }
0x1d98   :  { %1410 = vrot.lane.b32.xlu0 %v2513_v3, %s2657_s25 }
0x1e0a   :  { %v1411_v9 = vpop.permute.xlu0 %1410 }
0x1e0b   :  { %v1413_v4 = vmul.f32 %v2511_v56, %v1411_v9 }
0x1e0d   :  { %v1415_v6 = vrot.slane %v1413_v4, 2 }
0x1e0f   :  { %1416 = vrot.lane.b32.xlu1 %v1415_v6, %s2658_s26 }
0x1e81   :  { %v1417_v7 = vpop.permute.xlu1 %1416 }
0x1e82   :  { %2264 = vmatmul.mubr.msk.f32.vlgmr.msra.gmra.mrb[12].mxu1 %vm143_vm3, %v1417_v7 }
0x1e83   :  { %2396 = vmatpush3.bf16.msra.mxu1 %v2850_v58  ;;  %2285 = vmatprep.mubr.msk.f32.mxu1 %vm2656_vm0, %v2655_v1 }
0x1e84   :  { %2397 = vmatprep.subr.bf16.mxu1 %v2654_v0 }
0x1e87   :  { %2399 = vmatpush3.bf16.msra.mxu1 %v2854_v5 }
0x1e88   :  { %2406 = vmatprep.subr.bf16.mxu1 %v2654_v0 }
0x1f55   :  { %v1486_v8 = vpop.f32.mrb[12].mxu1 }
0x1f56   :  { %v1491_v11 = vrot.slane %v1486_v8, 5  ;;  %v2265_v12 = vpop.f32.mrb[13].mxu1 }
0x1f58   :  { %v1493_v14 = vadd.f32 %v1491_v11, %v2882_v10 }
0x1f5a   :  { %2514 = vtanh.f32 %v1493_v14  ;;  %v2022_v16 = vmul.f32 -1.442695, %v1493_v14 }
0x1f5c   :  { %2516 = vpow2.f32 %v2022_v16 }
0x1f64   :  { %v2515_v15 = vpop.eup %2514 }
0x1f65   :  { %1506 = vrot.lane.b32.xlu0 %v2515_v15, %s2657_s25 }
0x1f66   :  { %v2517_v17 = vpop.eup %2516 }
0x1f67   :  { %v1497_v18 = vadd.f32 1.0, %v2517_v17 }
0x1f69   :  { %2518 = vrcp.f32 %v1497_v18 }
0x1f73   :  { %v2519_v19 = vpop.eup %2518 }
0x1f74   :  { %v1504_v23 = vmul.f32 %v2519_v19, %v1502_v22 }
0x1fd7   :  { %v1507_v20 = vpop.permute.xlu0 %1506 }
0x1fd8   :  { %v1509_v21 = vmul.f32 %v2519_v19, %v1507_v20 }
0x1fda   :  { %1511 = vrot.lane.b32.xlu1 %v1509_v21, %s2658_s26 }
0x204c   :  { %v1512_v24 = vpop.permute.xlu1 %1511 }
0x204d   :  { %v1514_v25 = vadd.f32 %v1512_v24, %v1504_v23 }
0x204f   :  { %2520 = vtanh.f32 %v1514_v25  ;;  %v1609_v42 = vrot.slane %v1514_v25, 7 }
0x2059   :  { %v2521_v26 = vpop.eup %2520 }
0x205a   :  { %1517 = vrot.lane.b32.xlu0 %v2521_v26, %s2657_s25 }
0x20cc   :  { %v1518_v27 = vpop.permute.xlu0 %1517 }
0x20cd   :  { %v1520_v28 = vmul.f32 %v2519_v19, %v1518_v27 }
0x20cf   :  { %v1522_v29 = vrot.slane %v1520_v28, 3 }
0x20d1   :  { %1523 = vrot.lane.b32.xlu1 %v1522_v29, %s2658_s26 }
0x2143   :  { %v1524_v30 = vpop.permute.xlu1 %1523 }
0x2144   :  { %2275 = vmatmul.mubr.msk.f32.vlgmr.msra.gmra.mrb[14].mxu0 %vm143_vm3, %v1524_v30 }
0x2145   :  { %2402 = vmatpush3.bf16.msra.mxu0 %v2850_v58  ;;  %2296 = vmatprep.mubr.msk.f32.mxu0 %vm2656_vm0, %v2655_v1 }
0x2146   :  { %2403 = vmatprep.subr.bf16.mxu0 %v2654_v0 }
0x2149   :  { %2405 = vmatpush3.bf16.msra.mxu0 %v2854_v5 }
0x2217   :  { %v1593_v31 = vpop.f32.mrb[14].mxu0 }
0x2218   :  { %v1598_v32 = vrot.slane %v1593_v31, 4  ;;  %v2276_v33 = vpop.f32.mrb[15].mxu0 }
0x221a   :  { %v1600_v34 = vadd.f32 %v1598_v32, %v2882_v10 }
0x221c   :  { %2522 = vtanh.f32 %v1600_v34  ;;  %v2024_v36 = vmul.f32 -1.442695, %v1600_v34 }
0x221e   :  { %2524 = vpow2.f32 %v2024_v36 }
0x2226   :  { %v2523_v35 = vpop.eup %2522 }
0x2227   :  { %1613 = vrot.lane.b32.xlu0 %v2523_v35, %s2657_s25 }
0x2228   :  { %v2525_v37 = vpop.eup %2524 }
0x2229   :  { %v1604_v38 = vadd.f32 1.0, %v2525_v37 }
0x222b   :  { %2526 = vrcp.f32 %v1604_v38 }
0x2235   :  { %v2527_v39 = vpop.eup %2526 }
0x2236   :  { %v1611_v43 = vmul.f32 %v2527_v39, %v1609_v42 }
0x2299   :  { %v1614_v40 = vpop.permute.xlu0 %1613 }
0x229a   :  { %v1616_v41 = vmul.f32 %v2527_v39, %v1614_v40 }
0x229c   :  { %1618 = vrot.lane.b32.xlu1 %v1616_v41, %s2658_s26 }
0x230e   :  { %v1619_v44 = vpop.permute.xlu1 %1618 }
0x230f   :  { %v1621_v45 = vadd.f32 %v1619_v44, %v1611_v43 }
0x2311   :  { %2528 = vtanh.f32 %v1621_v45 }
0x231b   :  { %v2529_v46 = vpop.eup %2528 }
0x231c   :  { %1624 = vrot.lane.b32.xlu0 %v2529_v46, %s2657_s25 }
0x238e   :  { %v1625_v47 = vpop.permute.xlu0 %1624 }
0x238f   :  { %v1627_v48 = vmul.f32 %v2527_v39, %v1625_v47 }
0x2391   :  { %v1629_v49 = vrot.slane %v1627_v48, 4 }
0x2393   :  { %1630 = vrot.lane.b32.xlu1 %v1629_v49, %s2658_s26 }
0x2405   :  { %v1631_v50 = vpop.permute.xlu1 %1630 }
0x2406   :  { %2286 = vmatmul.mubr.msk.f32.vlgmr.msra.gmra.mrb[14].mxu1 %vm143_vm3, %v1631_v50 }
0x2407   :  { %2408 = vmatpush3.bf16.msra.mxu1 %v2850_v58  ;;  %2307 = vmatprep.mubr.msk.f32.mxu1 %vm2656_vm0, %v2655_v1 }
0x2408   :  { %2409 = vmatprep.subr.bf16.mxu1 %v2654_v0  ;;  %v1716_v0 = vrot.slane %v1621_v45, 7 }
0x240b   :  { %2411 = vmatpush3.bf16.msra.mxu1 %v2854_v5 }
0x24d9   :  { %v1700_v13 = vpop.f32.mrb[14].mxu1 }
0x24da   :  { %v1705_v52 = vrot.slane %v1700_v13, 3  ;;  %v2287_v53 = vpop.f32.mrb[15].mxu1 }
0x24dc   :  { %v1707_v54 = vadd.f32 %v1705_v52, %v2882_v10 }
0x24de   :  { %2530 = vtanh.f32 %v1707_v54  ;;  %v2026_v56 = vmul.f32 -1.442695, %v1707_v54 }
0x24e0   :  { %2532 = vpow2.f32 %v2026_v56 }
0x24e8   :  { %v2531_v55 = vpop.eup %2530 }
0x24e9   :  { %1720 = vrot.lane.b32.xlu0 %v2531_v55, %s2657_s25 }
0x24ea   :  { %v2533_v57 = vpop.eup %2532 }
0x24eb   :  { %v1711_v58 = vadd.f32 1.0, %v2533_v57 }
0x24ed   :  { %2534 = vrcp.f32 %v1711_v58 }
0x24f7   :  { %v2535_v59 = vpop.eup %2534 }
0x24f8   :  { %v1718_v5 = vmul.f32 %v2535_v59, %v1716_v0 }
0x255b   :  { %v1721_v1 = vpop.permute.xlu0 %1720 }
0x255c   :  { %v1723_v60 = vmul.f32 %v2535_v59, %v1721_v1 }
0x255e   :  { %1725 = vrot.lane.b32.xlu1 %v1723_v60, %s2658_s26 }
0x25d0   :  { %v1726_v61 = vpop.permute.xlu1 %1725 }
0x25d1   :  { %v1728_v62 = vadd.f32 %v1726_v61, %v1718_v5 }
0x25d3   :  { %2536 = vtanh.f32 %v1728_v62  ;;  %v1823_v21 = vrot.slane %v1728_v62, 7 }
0x25dd   :  { %v2537_v63 = vpop.eup %2536 }
0x25de   :  { %1731 = vrot.lane.b32.xlu0 %v2537_v63, %s2657_s25 }
0x2650   :  { %v1732_v3 = vpop.permute.xlu0 %1731 }
0x2651   :  { %v1734_v9 = vmul.f32 %v2535_v59, %v1732_v3 }
0x2653   :  { %v1736_v4 = vrot.slane %v1734_v9, 5 }
0x2655   :  { %1737 = vrot.lane.b32.xlu1 %v1736_v4, %s2658_s26 }
0x26c7   :  { %v1738_v6 = vpop.permute.xlu1 %1737 }
0x26c8   :  { %2297 = vmatmul.mubr.msk.f32.vlgmr.msra.gmra.mrb[16].mxu0 %vm143_vm3, %v1738_v6 }
0x279b   :  { %v1807_v7 = vpop.f32.mrb[16].mxu0 }
0x279c   :  { %v1812_v8 = vrot.slane %v1807_v7, 2  ;;  %v2298_v11 = vpop.f32.mrb[17].mxu0 }
0x279e   :  { %v1814_v12 = vadd.f32 %v1812_v8, %v2882_v10 }
0x27a0   :  { %2538 = vtanh.f32 %v1814_v12  ;;  %v2028_v15 = vmul.f32 -1.442695, %v1814_v12 }
0x27a2   :  { %2540 = vpow2.f32 %v2028_v15 }
0x27aa   :  { %v2539_v14 = vpop.eup %2538 }
0x27ab   :  { %1827 = vrot.lane.b32.xlu0 %v2539_v14, %s2657_s25 }
0x27ac   :  { %v2541_v16 = vpop.eup %2540 }
0x27ad   :  { %v1818_v17 = vadd.f32 1.0, %v2541_v16 }
0x27af   :  { %2542 = vrcp.f32 %v1818_v17 }
0x27b9   :  { %v2543_v18 = vpop.eup %2542 }
0x27ba   :  { %v1825_v22 = vmul.f32 %v2543_v18, %v1823_v21 }
0x281d   :  { %v1828_v19 = vpop.permute.xlu0 %1827 }
0x281e   :  { %v1830_v20 = vmul.f32 %v2543_v18, %v1828_v19 }
0x2820   :  { %1832 = vrot.lane.b32.xlu1 %v1830_v20, %s2658_s26 }
0x2892   :  { %v1833_v23 = vpop.permute.xlu1 %1832 }
0x2893   :  { %v1835_v24 = vadd.f32 %v1833_v23, %v1825_v22 }
0x2895   :  { %2544 = vtanh.f32 %v1835_v24  ;;  %v1930_v41 = vrot.slane %v1835_v24, 7 }
0x289f   :  { %v2545_v25 = vpop.eup %2544 }
0x28a0   :  { %1838 = vrot.lane.b32.xlu0 %v2545_v25, %s2657_s25 }
0x2912   :  { %v1839_v26 = vpop.permute.xlu0 %1838 }
0x2913   :  { %v1841_v27 = vmul.f32 %v2543_v18, %v1839_v26 }
0x2915   :  { %v1843_v28 = vrot.slane %v1841_v27, 6 }
0x2917   :  { %1844 = vrot.lane.b32.xlu1 %v1843_v28, %s2658_s26 }
0x2989   :  { %v1845_v29 = vpop.permute.xlu1 %1844 }
0x298a   :  { %2308 = vmatmul.mubr.msk.f32.vlgmr.msra.gmra.mrb[16].mxu1 %vm143_vm3, %v1845_v29 }
0x2a5d   :  { %v1914_v30 = vpop.f32.mrb[16].mxu1 }
0x2a5e   :  { %v1919_v31 = vrot.slane %v1914_v30, 1  ;;  %v2309_v32 = vpop.f32.mrb[17].mxu1 }
0x2a60   :  { %v1921_v33 = vadd.f32 %v1919_v31, %v2882_v10 }
0x2a62   :  { %2546 = vtanh.f32 %v1921_v33  ;;  %v2030_v35 = vmul.f32 -1.442695, %v1921_v33 }
0x2a64   :  { %2548 = vpow2.f32 %v2030_v35 }
0x2a6c   :  { %v2547_v34 = vpop.eup %2546 }
0x2a6d   :  { %1934 = vrot.lane.b32.xlu0 %v2547_v34, %s2657_s25 }
0x2a6e   :  { %v2549_v36 = vpop.eup %2548 }
0x2a6f   :  { %v1925_v37 = vadd.f32 1.0, %v2549_v36 }
0x2a71   :  { %2550 = vrcp.f32 %v1925_v37 }
0x2a7b   :  { %v2551_v38 = vpop.eup %2550 }
0x2a7c   :  { %v1932_v42 = vmul.f32 %v2551_v38, %v1930_v41 }
0x2adf   :  { %v1935_v39 = vpop.permute.xlu0 %1934 }
0x2ae0   :  { %v1937_v40 = vmul.f32 %v2551_v38, %v1935_v39 }
0x2ae2   :  { %1939 = vrot.lane.b32.xlu1 %v1937_v40, %s2658_s26 }
0x2ae6   :  { %991 = vrot.lane.b32.xlu1 %v2868_v2, %s2658_s26 }
0x2b54   :  { %v1940_v10 = vpop.permute.xlu1 %1939 }
0x2b55   :  { %v1942_v43 = vadd.f32 %v1940_v10, %v1932_v42 }
0x2b57   :  { %2552 = vtanh.f32 %v1942_v43 }
0x2b58   :  { %v992_v44 = vpop.permute.xlu1 %991 }
0x2b59   :  { %995 = vst.msk [vmem:[#allocation7 - $0x7] sm:$0x80] %vm994_vm10, %v992_v44 }
0x2b61   :  { %v2553_v45 = vpop.eup %2552 }
0x2b62   :  { %1945 = vrot.lane.b32.xlu0 %v2553_v45, %s2657_s25 }
0x2b66   :  { %997 = vrot.lane.b32.xlu0 %v2847_v51, %s2659_s4 }
0x2b6a   :  { %1956 = vrot.lane.b32.xlu0 %v1942_v43, %s2659_s4 }
0x2bd4   :  { %v1946_v46 = vpop.permute.xlu0 %1945 }
0x2bd5   :  { %v1948_v47 = vmul.f32 %v2551_v38, %v1946_v46 }
0x2bd7   :  { %1950 = vrot.lane.b32.xlu1 %v1948_v47, %s2658_s26 }
0x2bd8   :  { %v998_v2 = vpop.permute.xlu0 %997 }
0x2bd9   :  { %1000 = vst.msk [vmem:[#allocation8 - $0x7] sm:$0x80] %vm994_vm10, %v998_v2 }
0x2bdc   :  { %v1957_v48 = vpop.permute.xlu0 %1956 }
0x2bdd   :  { %1960 = vst.msk [vmem:[#allocation8 - $0x6] sm:$0x80] %vm994_vm10, %v1957_v48 }
0x2bde   :  { %2609 = shalt.err (!%p2606_p6)
}
0x2bdf   :  { %s2610_s10 = scalar_lea.hbm %s2996_s6, 32 }
0x2be0   :  { %p2611_p7 = scmp.ne.s32.totalorder %s2996_s6, %s2610_s10  ;;  %p2614_p8 = scmp.lt.u32.totalorder %s2610_s10, %s2996_s6 }
0x2be2   :  { %p2616_p9 = pnand %p2614_p8, %p2611_p7 }
0x2be4   :  { %2619 = shalt.err (!%p2616_p9)
}
0x2be5   :  { %s2661_s15 = smov 16   ;;  %s2662_s16 = smov 1  }
0x2be6   :  { %1984 = dma.vmem_to_hbm [thread:$0]  %s1979_s30, 32, %s2996_s6, [#allocation9], %s2661_s15, %s2661_s15, %s2662_s16  }
0x2be7   :  { %s2663_s19 = smov [#allocation7]  }
0x2be8   :  { %s1966_s20 = sshll.u32 %s2663_s19, 4  ;;  %s1967_s20 = int_to_ptr.vmem [resolvable:$true] %s1966_s20 }
0x2be9   :  { %s2620_s2 = scalar_lea.vmem %s1967_s20, 32  ;;  %p2625_p11 = scmp.lt.s32.totalorder %s1967_s20, %s1967_s20 }
0x2bea   :  { %p2621_p10 = scmp.ne.s32.totalorder %s1967_s20, %s2620_s2  ;;  %p2626_p12 = scmp.lt.s32.totalorder %s2620_s2, %s2620_s2 }
0x2bec   :  { %p2627_p13 = por %p2626_p12, %p2625_p11 }
0x2bee   :  { %p2628_p0 = pnand %p2627_p13, %p2621_p10 }
0x2c49   :  { %v1951_v51 = vpop.permute.xlu1 %1950 }
0x2c4a   :  { %1954 = vst.msk [vmem:[#allocation7 - $0x6] sm:$0x80] %vm994_vm10, %v1951_v51 }
0x2c4b   :  { %2631 = shalt.err (!%p2628_p0)
}
0x2c4c   :  { %s2632_s22 = scalar_lea.hbm %s2995_s5, 32 }
0x2c4d   :  { %p2633_p1 = scmp.ne.s32.totalorder %s2995_s5, %s2632_s22  ;;  %p2636_p2 = scmp.lt.u32.totalorder %s2632_s22, %s2995_s5 }
0x2c4f   :  { %p2638_p3 = pnand %p2636_p2, %p2633_p1 }
0x2c51   :  { %2641 = shalt.err (!%p2638_p3)
}
0x2c52   :  { %1972 = dma.vmem_to_hbm [thread:$0]  %s1967_s20, 32, %s2995_s5, [#allocation4], %s2661_s15, %s2661_s15, %s2662_s16  }
0x2c53   :  { %2646 = dma.done.wait [#allocation4], 32  }
0x2c54   :  { %2647 = vsyncadd [#allocation4], 4294967264 }
0x2c55   :  { %2648 = dma.done.wait [#allocation9], 32  }
0x2c56   :  { %2649 = vsyncadd [#allocation9], 4294967264 }
0x2c57   :  { %1991 = vsyncpa [#allocation3], 1 }
0x2c58   :  { %1992 = vsyncpa [#allocation6], 1 }
0x2c59   :  { %1993 = vsyncpa [#allocation4], 1 }
0x2c5a   :  { %1994 = vsyncpa [#allocation9], 1 }

</bundles_post_ra>
